<compile_context>
chip_gen: v5e
topology: v5e:2x2
jax: 0.10.0
libtpu: 0.0.40
codegen_flags: <defaults>
</compile_context>

<pallas_src>
import functools

import jax
import jax.numpy as jnp
import numpy as np
from jax import lax
from jax.experimental import pallas as pl
from jax.experimental.pallas import tpu as pltpu

_TARGET_ROWS = 512  # matmul-M rows per grid step at large batch sizes


# -----------------------------------------------------------------------------
# Wrapper-side weight / layout preparation
# -----------------------------------------------------------------------------
def _band_weights_folded(w_oihw, width, fold):
    """(Cout, Cin, 3, 3) conv weight -> (3, fold*W*Cin, fold*W*Cout) banded matrices.

    Leading index o: o=0 multiplies the previous folded row, o=1 the current one,
    o=2 the next one. Horizontal taps + horizontal SAME padding live inside each
    per-row band; vertical taps within a folded row live in the off-diagonal blocks.
    """
    cout, cin = int(w_oihw.shape[0]), int(w_oihw.shape[1])
    # per-image-row horizontal band for each kernel row ky: (3, W*Cin, W*Cout)
    wi = np.arange(width)[:, None]
    wo = np.arange(width)[None, :]
    sel = np.stack([(wi == wo + dx - 1) for dx in range(3)], axis=0).astype(np.float32)
    wt = jnp.transpose(w_oihw, (2, 3, 1, 0))                        # (ky, dx, ci, co)
    band = jnp.einsum("dio,ydck->yicok", jnp.asarray(sel), wt)
    band = band.reshape(3, width * cin, width * cout)

    kb, nb = width * cin, width * cout
    out = jnp.zeros((3, fold * kb, fold * nb), jnp.float32)
    for o in range(3):                       # o - 1 = folded-row offset of the LHS slab
        for fi in range(fold):
            for fo in range(fold):
                ky = (o - 1) * fold + fi - fo + 1
                if 0 <= ky <= 2:
                    out = out.at[o, fi * kb:(fi + 1) * kb, fo * nb:(fo + 1) * nb].set(band[ky])
    return out


def _pick_fold(h, lane_min):
    """Smallest power-of-two row fold making the narrowest lane width >= 128."""
    f = 1
    while lane_min * f < 128 and h % (f * 2) == 0:
        f *= 2
    return f


def _pick_batch_tile(n, rows_per_img, target=_TARGET_ROWS):
    """Images per grid step: ~target matmul rows, sublane-aligned, dividing n."""
    cands = [b for b in range(1, n + 1)
             if n % b == 0 and (b * rows_per_img) % 8 == 0 and b * rows_per_img <= target]
    if cands:
        return max(cands)
    cands = [b for b in range(1, n + 1) if n % b == 0 and (b * rows_per_img) % 8 == 0]
    if cands:
        return min(cands)
    return n  # single full-array block (always BlockSpec-legal)


def _to_rows(x_nchw, fold):
    """NCHW f32 -> (N*H/fold, fold*W*C) bf16. No padding, single transpose+cast."""
    n, c, h, w = x_nchw.shape
    xr = jnp.transpose(x_nchw, (0, 2, 3, 1)).reshape(n * (h // fold), fold * w * c)
    return xr.astype(jnp.bfloat16)


def _from_rows(y_rows, n, h, w, cout):
    """(N*H/fold, fold*W*Cout) -> NCHW (free row-major reshape + one transpose)."""
    return jnp.transpose(y_rows.reshape(n, h, w, cout), (0, 3, 1, 2))


def _fold_bias(bias, fold, width):
    return jnp.tile(bias.astype(jnp.float32), fold * width).reshape(1, -1)


# -----------------------------------------------------------------------------
# In-kernel banded 3x3 conv (shared by fused and single-conv kernels)
# -----------------------------------------------------------------------------
def _banded_conv(x_bf, stage_ref, w_ref, b_row, not_first, not_last, relu):
    """One SAME 3x3 conv on a (RB, K) bf16 slab of folded image rows.

    x_bf:     (RB, K) bf16 value (current folded rows).
    stage_ref:(RB+2, K) f32 scratch; rows [1:RB+1] hold x, rows 0/RB+1 are slack
              (only ever read at masked positions).
    w_ref:    (3, K, N) bf16 banded weights (prev / current / next folded row).
    b_row:    (1, N) f32 bias row.
    not_first / not_last: (RB, 1) bool masks for per-image vertical boundaries.
    """
    rb = x_bf.shape[0]
    stage_ref[pl.ds(1, rb), :] = x_bf.astype(jnp.float32)
    above = jnp.where(not_first, stage_ref[pl.ds(0, rb), :], 0.0).astype(jnp.bfloat16)
    below = jnp.where(not_last, stage_ref[pl.ds(2, rb), :], 0.0).astype(jnp.bfloat16)

    y = jnp.dot(above, w_ref[0], preferred_element_type=jnp.float32)
    y = y + jnp.dot(x_bf, w_ref[1], preferred_element_type=jnp.float32)
    y = y + jnp.dot(below, w_ref[2], preferred_element_type=jnp.float32)
    y = y + b_row
    if relu:
        y = jnp.maximum(y, 0.0)
    return y                                   # (RB, N) f32


def _fused_autoencoder_kernel(x_ref, we_ref, be_ref, wd_ref, bd_ref, o_ref,
                              xs_ref, hs_ref, *, rows_per_img):
    rb = x_ref.shape[0]

    @pl.when(pl.program_id(0) == 0)
    def _init():  # one-time hygiene: zero the (never-used-unmasked) slack rows
        xs_ref[...] = jnp.zeros(xs_ref.shape, xs_ref.dtype)
        hs_ref[...] = jnp.zeros(hs_ref.shape, hs_ref.dtype)

    r = lax.broadcasted_iota(jnp.int32, (rb, 1), 0) % rows_per_img
    not_first = r != 0
    not_last = r != rows_per_img - 1

    # encode: conv3x3 + bias + ReLU
    h = _banded_conv(x_ref[...], xs_ref, we_ref, be_ref[...], not_first, not_last, True)
    # decode: conv3x3 + bias (hidden never leaves VMEM/vregs)
    y = _banded_conv(h.astype(jnp.bfloat16), hs_ref, wd_ref, bd_ref[...],
                     not_first, not_last, False)
    o_ref[...] = y.astype(o_ref.dtype)


def _conv3x3_kernel(x_ref, w_ref, b_ref, o_ref, xs_ref, *, rows_per_img, relu):
    rb = x_ref.shape[0]

    @pl.when(pl.program_id(0) == 0)
    def _init():
        xs_ref[...] = jnp.zeros(xs_ref.shape, xs_ref.dtype)

    r = lax.broadcasted_iota(jnp.int32, (rb, 1), 0) % rows_per_img
    not_first = r != 0
    not_last = r != rows_per_img - 1
    y = _banded_conv(x_ref[...], xs_ref, w_ref, b_ref[...], not_first, not_last, relu)
    o_ref[...] = y.astype(o_ref.dtype)


# -----------------------------------------------------------------------------
# pallas_call wrappers
# -----------------------------------------------------------------------------
@jax.jit
def autoencoder_forward_pallas(x, w_enc, b_enc, w_dec, b_dec):
    """Fused decode(encode(x)) in a single pallas_call. x is NCHW."""
    n, cin, h, w = x.shape
    chid = int(w_enc.shape[0])
    cout = int(w_dec.shape[0])

    fold = _pick_fold(h, w * min(cin, chid, cout))
    hf = h // fold
    b_tile = _pick_batch_tile(n, hf)
    rb = b_tile * hf
    kin, khid, kout = fold * w * cin, fold * w * chid, fold * w * cout
    m_total = n * hf

    x_rows = _to_rows(x, fold)                                     # (m_total, kin) bf16
    we = _band_weights_folded(w_enc, w, fold).astype(jnp.bfloat16)  # (3, kin, khid)
    be = _fold_bias(b_enc, fold, w)                                 # (1, khid)
    wd = _band_weights_folded(w_dec, w, fold).astype(jnp.bfloat16)  # (3, khid, kout)
    bd = _fold_bias(b_dec, fold, w)                                 # (1, kout)

    # FLOPs actually issued by the 3 banded dots per conv (not the mathematical conv count).
    flops = 6 * m_total * (kin * khid + khid * kout)
    bytes_accessed = (x_rows.size * 2 + we.size * 2 + wd.size * 2
                      + be.size * 4 + bd.size * 4 + m_total * kout * 4)

    y_rows = pl.pallas_call(
        functools.partial(_fused_autoencoder_kernel, rows_per_img=hf),
        out_shape=jax.ShapeDtypeStruct((m_total, kout), x.dtype),
        grid=(m_total // rb,),
        in_specs=[
            pl.BlockSpec((rb, kin), lambda i: (i, 0)),              # row-slab of images
            pl.BlockSpec((3, kin, khid), lambda i: (0, 0, 0)),      # resident enc weights
            pl.BlockSpec((1, khid), lambda i: (0, 0)),              # resident enc bias
            pl.BlockSpec((3, khid, kout), lambda i: (0, 0, 0)),     # resident dec weights
            pl.BlockSpec((1, kout), lambda i: (0, 0)),              # resident dec bias
        ],
        out_specs=pl.BlockSpec((rb, kout), lambda i: (i, 0)),
        scratch_shapes=[pltpu.VMEM((rb + 2, kin), jnp.float32),     # input staging (+halo slack)
                        pltpu.VMEM((rb + 2, khid), jnp.float32)],   # hidden staging
        compiler_params=pltpu.CompilerParams(
            dimension_semantics=("parallel",),   # image-group slabs shard across TCs
            vmem_limit_bytes=32 * 1024 * 1024,
        ),
        cost_estimate=pl.CostEstimate(
            flops=flops, transcendentals=0, bytes_accessed=bytes_accessed),
    )(x_rows, we, be, wd, bd)

    return _from_rows(y_rows, n, h, w, cout)


@functools.partial(jax.jit, static_argnames=("relu",))
def conv3x3_pallas(x, w_oihw, bias, *, relu):
    """Standalone 3x3 conv (stride 1, pad 1), NCHW in/out. Used by encode()/decode()."""
    n, cin, h, w = x.shape
    cout = int(w_oihw.shape[0])

    fold = _pick_fold(h, w * min(cin, cout))
    hf = h // fold
    b_tile = _pick_batch_tile(n, hf)
    rb = b_tile * hf
    kin, kout = fold * w * cin, fold * w * cout
    m_total = n * hf

    x_rows = _to_rows(x, fold)
    wb = _band_weights_folded(w_oihw, w, fold).astype(jnp.bfloat16)
    br = _fold_bias(bias, fold, w)

    y_rows = pl.pallas_call(
        functools.partial(_conv3x3_kernel, rows_per_img=hf, relu=relu),
        out_shape=jax.ShapeDtypeStruct((m_total, kout), x.dtype),
        grid=(m_total // rb,),
        in_specs=[
            pl.BlockSpec((rb, kin), lambda i: (i, 0)),
            pl.BlockSpec((3, kin, kout), lambda i: (0, 0, 0)),
            pl.BlockSpec((1, kout), lambda i: (0, 0)),
        ],
        out_specs=pl.BlockSpec((rb, kout), lambda i: (i, 0)),
        scratch_shapes=[pltpu.VMEM((rb + 2, kin), jnp.float32)],
        compiler_params=pltpu.CompilerParams(
            dimension_semantics=("parallel",),
            vmem_limit_bytes=32 * 1024 * 1024),
        cost_estimate=pl.CostEstimate(
            flops=6 * m_total * kin * kout, transcendentals=0,
            bytes_accessed=x_rows.size * 2 + wb.size * 2 + br.size * 4 + m_total * kout * 4),
    )(x_rows, wb, br)
    return _from_rows(y_rows, n, h, w, cout)


# -----------------------------------------------------------------------------
# ConvAutoEncoderBase (JAX/Pallas version)
# -----------------------------------------------------------------------------
class ConvAutoEncoderBase:
    def __init__(self, name, cin=4, chid=8, key=None, log=False):
        self.name = name
        if key is None:
            key = jax.random.PRNGKey(0)
        k1, k2, k3, k4 = jax.random.split(key, 4)
        # Deterministic init, kaiming-uniform-style bounds (PyTorch Conv2d default).
        be = 1.0 / np.sqrt(cin * 3 * 3)
        bd = 1.0 / np.sqrt(chid * 3 * 3)
        self.w_enc = jax.random.uniform(k1, (chid, cin, 3, 3), jnp.float32, -be, be)
        self.b_enc = jax.random.uniform(k2, (chid,), jnp.float32, -be, be)
        self.w_dec = jax.random.uniform(k3, (cin, chid, 3, 3), jnp.float32, -bd, bd)
        self.b_dec = jax.random.uniform(k4, (cin,), jnp.float32, -bd, bd)
        if log:
            self._log()

    def _log(self):
        # TODO(synk): mlflow.set_tag has no Pallas/JAX equivalent; skipped.
        pass

    def encode(self, x):
        return conv3x3_pallas(x, self.w_enc, self.b_enc, relu=True)

    def decode(self, x):
        return conv3x3_pallas(x, self.w_dec, self.b_dec, relu=False)

    def predict(self, x):
        return self(x)

    def __call__(self, x):
        # Fused encode+decode: the hidden activation never leaves VMEM.
        return autoencoder_forward_pallas(x, self.w_enc, self.b_enc,
                                          self.w_dec, self.b_dec)


# -----------------------------------------------------------------------------
# Pure-JAX reference (lax.conv with the same bf16-operand / f32-accum numerics)
# -----------------------------------------------------------------------------
def _ref_conv(x, w, b, relu):
    y = jax.lax.conv_general_dilated(
        x.astype(jnp.bfloat16), w.astype(jnp.bfloat16),
        window_strides=(1, 1), padding="SAME",
        dimension_numbers=("NCHW", "OIHW", "NCHW"),
        preferred_element_type=jnp.float32)
    y = y + b[None, :, None, None]
    if relu:
        y = jnp.maximum(y, 0.0)
    return y


def _ref_forward(model, x):
    h = _ref_conv(x, model.w_enc, model.b_enc, relu=True)
    return _ref_conv(h, model.w_dec, model.b_dec, relu=False)


if __name__ == "__main__":
    key = jax.random.PRNGKey(0)
    kx, kp = jax.random.split(key)

    N, C, H, W = 2, 4, 16, 16
    x = jax.random.normal(kx, (N, C, H, W), jnp.float32)

    model = ConvAutoEncoderBase("conv_autoencoder_base", cin=C, chid=8, key=kp)

    # Fused forward (the nn.Module forward()).
    y = jax.block_until_ready(model.predict(x))
    y_ref = jax.block_until_ready(_ref_forward(model, x))
    assert y.shape == (N, C, H, W)
    np.testing.assert_allclose(np.asarray(y), np.asarray(y_ref), atol=1e-2, rtol=1e-2)

    # Un-fused encode()/decode() path (same kernels, standalone convs).
    y2 = jax.block_until_ready(model.decode(model.encode(x)))
    np.testing.assert_allclose(np.asarray(y2), np.asarray(y_ref), atol=1e-2, rtol=1e-2)

    print("KERNEL_OK")
</pallas_src>

<mosaic_0001>
module attributes {stable_mosaic.version = 11 : i64} {
  func.func @_fused_autoencoder_kernel(%arg0: i32, %arg1: memref<16x128xbf16, #tpu.memory_space<vmem>>, %arg2: memref<3x128x256xbf16, #tpu.memory_space<vmem>>, %arg3: memref<1x256xf32, #tpu.memory_space<vmem>>, %arg4: memref<3x256x128xbf16, #tpu.memory_space<vmem>>, %arg5: memref<1x128xf32, #tpu.memory_space<vmem>>, %arg6: memref<16x128xf32, #tpu.memory_space<vmem>>, %arg7: memref<18x128xf32, #tpu.memory_space<vmem>>, %arg8: memref<18x256xf32, #tpu.memory_space<vmem>>) attributes {dimension_semantics = [#tpu.dimension_semantics<parallel>], iteration_bounds = array<i64: 1>, scalar_prefetch = 0 : i64, scratch_operands = 2 : i64, tpu.core_type = #tpu.core_type<tc>, window_params = [{transform_indices = @transform_0, window_bounds = array<i64: 16, 128>}, {pipeline_mode = #tpu.pipeline_mode<synchronous>, transform_indices = @transform_1, window_bounds = array<i64: 3, 128, 256>}, {pipeline_mode = #tpu.pipeline_mode<synchronous>, transform_indices = @transform_2, window_bounds = array<i64: 1, 256>}, {pipeline_mode = #tpu.pipeline_mode<synchronous>, transform_indices = @transform_3, window_bounds = array<i64: 3, 256, 128>}, {pipeline_mode = #tpu.pipeline_mode<synchronous>, transform_indices = @transform_4, window_bounds = array<i64: 1, 128>}, {transform_indices = @transform_5, window_bounds = array<i64: 16, 128>}]} {
    %c0_i32 = arith.constant 0 : i32
    %0 = arith.cmpi eq, %arg0, %c0_i32 : i32
    %1 = arith.extui %0 : i1 to i32
    %c0_i32_0 = arith.constant 0 : i32
    %2 = arith.cmpi ne, %1, %c0_i32_0 : i32
    scf.if %2 {
      %cst_51 = arith.constant 0.000000e+00 : f32
      %85 = vector.broadcast %cst_51 : f32 to vector<18x128xf32>
      %c0_52 = arith.constant 0 : index
      %c0_53 = arith.constant 0 : index
      %86 = vector.load %arg7[%c0_52, %c0_53] : memref<18x128xf32, #tpu.memory_space<vmem>>, vector<18x128xf32>
      tpu.vector_store %arg7[%c0_52, %c0_53], %85 {strides = array<i32>} : memref<18x128xf32, #tpu.memory_space<vmem>>, vector<18x128xf32>,
      %cst_54 = arith.constant 0.000000e+00 : f32
      %87 = vector.broadcast %cst_54 : f32 to vector<18x256xf32>
      %c0_55 = arith.constant 0 : index
      %c0_56 = arith.constant 0 : index
      %88 = vector.load %arg8[%c0_55, %c0_56] : memref<18x256xf32, #tpu.memory_space<vmem>>, vector<18x256xf32>
      tpu.vector_store %arg8[%c0_55, %c0_56], %87 {strides = array<i32>} : memref<18x256xf32, #tpu.memory_space<vmem>>, vector<18x256xf32>,
    } else {
    }
    %3 = tpu.iota {dimensions = array<i32: 0>} : vector<16x1xi32>
    %c8_i32 = arith.constant 8 : i32
    %c0_i32_1 = arith.constant 0 : i32
    %4 = arith.cmpi eq, %c8_i32, %c0_i32_1 : i32
    %c1_i32 = arith.constant 1 : i32
    %5 = arith.select %4, %c1_i32, %c8_i32 : i32
    %6 = vector.broadcast %5 : i32 to vector<16x1xi32>
    %7 = arith.remsi %3, %6 : vector<16x1xi32>
    %c0_i32_2 = arith.constant 0 : i32
    %8 = vector.broadcast %c0_i32_2 : i32 to vector<16x1xi32>
    %9 = arith.cmpi ne, %7, %8 : vector<16x1xi32>
    %c0_i32_3 = arith.constant 0 : i32
    %10 = vector.broadcast %c0_i32_3 : i32 to vector<16x1xi32>
    %11 = arith.cmpi slt, %7, %10 : vector<16x1xi32>
    %c0_i32_4 = arith.constant 0 : i32
    %12 = arith.cmpi slt, %5, %c0_i32_4 : i32
    %13 = vector.broadcast %12 : i1 to vector<16x1xi1>
    %14 = vector.broadcast %13 : vector<16x1xi1> to vector<16x1xi1>
    %15 = arith.xori %11, %14 : vector<16x1xi1>
    %16 = arith.andi %15, %9 : vector<16x1xi1>
    %17 = vector.broadcast %5 : i32 to vector<16x1xi32>
    %18 = arith.addi %7, %17 : vector<16x1xi32>
    %19 = arith.select %16, %18, %7 : vector<16x1xi1>, vector<16x1xi32>
    %c0_i32_5 = arith.constant 0 : i32
    %20 = vector.broadcast %c0_i32_5 : i32 to vector<16x1xi32>
    %21 = arith.cmpi ne, %19, %20 : vector<16x1xi32>
    %c7_i32 = arith.constant 7 : i32
    %22 = vector.broadcast %c7_i32 : i32 to vector<16x1xi32>
    %23 = arith.cmpi ne, %19, %22 : vector<16x1xi32>
    %c0 = arith.constant 0 : index
    %c0_6 = arith.constant 0 : index
    %24 = vector.load %arg1[%c0, %c0_6] : memref<16x128xbf16, #tpu.memory_space<vmem>>, vector<16x128xbf16>
    %c0_7 = arith.constant 0 : index
    %c0_8 = arith.constant 0 : index
    %25 = vector.load %arg3[%c0_7, %c0_8] : memref<1x256xf32, #tpu.memory_space<vmem>>, vector<1x256xf32>
    %26 = arith.extf %24 : vector<16x128xbf16> to vector<16x128xf32>
    %c1 = arith.constant 1 : index
    %c0_9 = arith.constant 0 : index
    %27 = vector.load %arg7[%c1, %c0_9] : memref<18x128xf32, #tpu.memory_space<vmem>>, vector<16x128xf32>
    tpu.vector_store %arg7[%c1, %c0_9], %26 {strides = array<i32>} : memref<18x128xf32, #tpu.memory_space<vmem>>, vector<16x128xf32>,
    %c0_10 = arith.constant 0 : index
    %c0_11 = arith.constant 0 : index
    %28 = vector.load %arg7[%c0_10, %c0_11] : memref<18x128xf32, #tpu.memory_space<vmem>>, vector<16x128xf32>
    %cst = arith.constant 0.000000e+00 : f32
    %29 = vector.shape_cast %21 : vector<16x1xi1> to vector<16x1xi1>
    %30 = vector.broadcast %29 : vector<16x1xi1> to vector<16x128xi1>
    %31 = vector.broadcast %cst : f32 to vector<16x128xf32>
    %32 = arith.select %30, %28, %31 : vector<16x128xi1>, vector<16x128xf32>
    %33 = arith.truncf %32 : vector<16x128xf32> to vector<16x128xbf16>
    %c2 = arith.constant 2 : index
    %c0_12 = arith.constant 0 : index
    %34 = vector.load %arg7[%c2, %c0_12] : memref<18x128xf32, #tpu.memory_space<vmem>>, vector<16x128xf32>
    %cst_13 = arith.constant 0.000000e+00 : f32
    %35 = vector.shape_cast %23 : vector<16x1xi1> to vector<16x1xi1>
    %36 = vector.broadcast %35 : vector<16x1xi1> to vector<16x128xi1>
    %37 = vector.broadcast %cst_13 : f32 to vector<16x128xf32>
    %38 = arith.select %36, %34, %37 : vector<16x128xi1>, vector<16x128xf32>
    %39 = arith.truncf %38 : vector<16x128xf32> to vector<16x128xbf16>
    %c0_14 = arith.constant 0 : index
    %c0_15 = arith.constant 0 : index
    %c0_16 = arith.constant 0 : index
    %40 = vector.load %arg2[%c0_14, %c0_15, %c0_16] : memref<3x128x256xbf16, #tpu.memory_space<vmem>>, vector<1x128x256xbf16>
    %41 = vector.shape_cast %40 : vector<1x128x256xbf16> to vector<128x256xbf16>
    %cst_17 = arith.constant dense<0.000000e+00> : vector<16x256xf32>
    %42 = tpu.matmul %33, %41, %cst_17 {dimension_numbers = #tpu.dot_dimension_numbers<[1], [0], [0], [1], [0, 0, 1, 1], [], []>} : vector<16x128xbf16>, vector<128x256xbf16>, vector<16x256xf32> -> vector<16x256xf32>
    %c1_18 = arith.constant 1 : index
    %c0_19 = arith.constant 0 : index
    %c0_20 = arith.constant 0 : index
    %43 = vector.load %arg2[%c1_18, %c0_19, %c0_20] : memref<3x128x256xbf16, #tpu.memory_space<vmem>>, vector<1x128x256xbf16>
    %44 = vector.shape_cast %43 : vector<1x128x256xbf16> to vector<128x256xbf16>
    %cst_21 = arith.constant dense<0.000000e+00> : vector<16x256xf32>
    %45 = tpu.matmul %24, %44, %cst_21 {dimension_numbers = #tpu.dot_dimension_numbers<[1], [0], [0], [1], [0, 0, 1, 1], [], []>} : vector<16x128xbf16>, vector<128x256xbf16>, vector<16x256xf32> -> vector<16x256xf32>
    %46 = arith.addf %42, %45 : vector<16x256xf32>
    %c2_22 = arith.constant 2 : index
    %c0_23 = arith.constant 0 : index
    %c0_24 = arith.constant 0 : index
    %47 = vector.load %arg2[%c2_22, %c0_23, %c0_24] : memref<3x128x256xbf16, #tpu.memory_space<vmem>>, vector<1x128x256xbf16>
    %48 = vector.shape_cast %47 : vector<1x128x256xbf16> to vector<128x256xbf16>
    %cst_25 = arith.constant dense<0.000000e+00> : vector<16x256xf32>
    %49 = tpu.matmul %39, %48, %cst_25 {dimension_numbers = #tpu.dot_dimension_numbers<[1], [0], [0], [1], [0, 0, 1, 1], [], []>} : vector<16x128xbf16>, vector<128x256xbf16>, vector<16x256xf32> -> vector<16x256xf32>
    %50 = arith.addf %46, %49 : vector<16x256xf32>
    %51 = vector.broadcast %25 : vector<1x256xf32> to vector<16x256xf32>
    %52 = arith.addf %50, %51 : vector<16x256xf32>
    %cst_26 = arith.constant 0.000000e+00 : f32
    %53 = vector.broadcast %cst_26 : f32 to vector<16x256xf32>
    %54 = arith.maximumf %52, %53 : vector<16x256xf32>
    %55 = arith.truncf %54 : vector<16x256xf32> to vector<16x256xbf16>
    %c0_27 = arith.constant 0 : index
    %c0_28 = arith.constant 0 : index
    %56 = vector.load %arg5[%c0_27, %c0_28] : memref<1x128xf32, #tpu.memory_space<vmem>>, vector<1x128xf32>
    %57 = arith.extf %55 : vector<16x256xbf16> to vector<16x256xf32>
    %c1_29 = arith.constant 1 : index
    %c0_30 = arith.constant 0 : index
    %58 = vector.load %arg8[%c1_29, %c0_30] : memref<18x256xf32, #tpu.memory_space<vmem>>, vector<16x256xf32>
    tpu.vector_store %arg8[%c1_29, %c0_30], %57 {strides = array<i32>} : memref<18x256xf32, #tpu.memory_space<vmem>>, vector<16x256xf32>,
    %c0_31 = arith.constant 0 : index
    %c0_32 = arith.constant 0 : index
    %59 = vector.load %arg8[%c0_31, %c0_32] : memref<18x256xf32, #tpu.memory_space<vmem>>, vector<16x256xf32>
    %cst_33 = arith.constant 0.000000e+00 : f32
    %60 = vector.shape_cast %21 : vector<16x1xi1> to vector<16x1xi1>
    %61 = vector.broadcast %60 : vector<16x1xi1> to vector<16x256xi1>
    %62 = vector.broadcast %cst_33 : f32 to vector<16x256xf32>
    %63 = arith.select %61, %59, %62 : vector<16x256xi1>, vector<16x256xf32>
    %64 = arith.truncf %63 : vector<16x256xf32> to vector<16x256xbf16>
    %c2_34 = arith.constant 2 : index
    %c0_35 = arith.constant 0 : index
    %65 = vector.load %arg8[%c2_34, %c0_35] : memref<18x256xf32, #tpu.memory_space<vmem>>, vector<16x256xf32>
    %cst_36 = arith.constant 0.000000e+00 : f32
    %66 = vector.shape_cast %23 : vector<16x1xi1> to vector<16x1xi1>
    %67 = vector.broadcast %66 : vector<16x1xi1> to vector<16x256xi1>
    %68 = vector.broadcast %cst_36 : f32 to vector<16x256xf32>
    %69 = arith.select %67, %65, %68 : vector<16x256xi1>, vector<16x256xf32>
    %70 = arith.truncf %69 : vector<16x256xf32> to vector<16x256xbf16>
    %c0_37 = arith.constant 0 : index
    %c0_38 = arith.constant 0 : index
    %c0_39 = arith.constant 0 : index
    %71 = vector.load %arg4[%c0_37, %c0_38, %c0_39] : memref<3x256x128xbf16, #tpu.memory_space<vmem>>, vector<1x256x128xbf16>
    %72 = vector.shape_cast %71 : vector<1x256x128xbf16> to vector<256x128xbf16>
    %cst_40 = arith.constant dense<0.000000e+00> : vector<16x128xf32>
    %73 = tpu.matmul %64, %72, %cst_40 {dimension_numbers = #tpu.dot_dimension_numbers<[1], [0], [0], [1], [0, 0, 1, 1], [], []>} : vector<16x256xbf16>, vector<256x128xbf16>, vector<16x128xf32> -> vector<16x128xf32>
    %c1_41 = arith.constant 1 : index
    %c0_42 = arith.constant 0 : index
    %c0_43 = arith.constant 0 : index
    %74 = vector.load %arg4[%c1_41, %c0_42, %c0_43] : memref<3x256x128xbf16, #tpu.memory_space<vmem>>, vector<1x256x128xbf16>
    %75 = vector.shape_cast %74 : vector<1x256x128xbf16> to vector<256x128xbf16>
    %cst_44 = arith.constant dense<0.000000e+00> : vector<16x128xf32>
    %76 = tpu.matmul %55, %75, %cst_44 {dimension_numbers = #tpu.dot_dimension_numbers<[1], [0], [0], [1], [0, 0, 1, 1], [], []>} : vector<16x256xbf16>, vector<256x128xbf16>, vector<16x128xf32> -> vector<16x128xf32>
    %77 = arith.addf %73, %76 : vector<16x128xf32>
    %c2_45 = arith.constant 2 : index
    %c0_46 = arith.constant 0 : index
    %c0_47 = arith.constant 0 : index
    %78 = vector.load %arg4[%c2_45, %c0_46, %c0_47] : memref<3x256x128xbf16, #tpu.memory_space<vmem>>, vector<1x256x128xbf16>
    %79 = vector.shape_cast %78 : vector<1x256x128xbf16> to vector<256x128xbf16>
    %cst_48 = arith.constant dense<0.000000e+00> : vector<16x128xf32>
    %80 = tpu.matmul %70, %79, %cst_48 {dimension_numbers = #tpu.dot_dimension_numbers<[1], [0], [0], [1], [0, 0, 1, 1], [], []>} : vector<16x256xbf16>, vector<256x128xbf16>, vector<16x128xf32> -> vector<16x128xf32>
    %81 = arith.addf %77, %80 : vector<16x128xf32>
    %82 = vector.broadcast %56 : vector<1x128xf32> to vector<16x128xf32>
    %83 = arith.addf %81, %82 : vector<16x128xf32>
    %c0_49 = arith.constant 0 : index
    %c0_50 = arith.constant 0 : index
    %84 = vector.load %arg6[%c0_49, %c0_50] : memref<16x128xf32, #tpu.memory_space<vmem>>, vector<16x128xf32>
    tpu.vector_store %arg6[%c0_49, %c0_50], %83 {strides = array<i32>} : memref<16x128xf32, #tpu.memory_space<vmem>>, vector<16x128xf32>,
    return
  }
  func.func @transform_0(%arg0: i32) -> (i32, i32) {
    %c0_i32 = arith.constant 0 : i32
    %c0_i32_0 = arith.constant 0 : i32
    return %arg0, %c0_i32 : i32, i32
  }
  func.func @transform_1(%arg0: i32) -> (i32, i32, i32) {
    %c0_i32 = arith.constant 0 : i32
    %c0_i32_0 = arith.constant 0 : i32
    %c0_i32_1 = arith.constant 0 : i32
    %c0_i32_2 = arith.constant 0 : i32
    return %c0_i32, %c0_i32_0, %c0_i32_1 : i32, i32, i32
  }
  func.func @transform_2(%arg0: i32) -> (i32, i32) {
    %c0_i32 = arith.constant 0 : i32
    %c0_i32_0 = arith.constant 0 : i32
    %c0_i32_1 = arith.constant 0 : i32
    return %c0_i32, %c0_i32_0 : i32, i32
  }
  func.func @transform_3(%arg0: i32) -> (i32, i32, i32) {
    %c0_i32 = arith.constant 0 : i32
    %c0_i32_0 = arith.constant 0 : i32
    %c0_i32_1 = arith.constant 0 : i32
    %c0_i32_2 = arith.constant 0 : i32
    return %c0_i32, %c0_i32_0, %c0_i32_1 : i32, i32, i32
  }
  func.func @transform_4(%arg0: i32) -> (i32, i32) {
    %c0_i32 = arith.constant 0 : i32
    %c0_i32_0 = arith.constant 0 : i32
    %c0_i32_1 = arith.constant 0 : i32
    return %c0_i32, %c0_i32_0 : i32, i32
  }
  func.func @transform_5(%arg0: i32) -> (i32, i32) {
    %c0_i32 = arith.constant 0 : i32
    %c0_i32_0 = arith.constant 0 : i32
    return %arg0, %c0_i32 : i32, i32
  }
}

</mosaic_0001>

<bundles_post_ra>
// kernel: tile.13
= control target key start
LH: loop header
LB: loop body
LE: loop exit
PB: predicated region body
PF: predicated region fallthrough
CT: control target
= control target key end

     0   :  { %s40_s0 = inlined_call_operand.vmem [shape: f32[8], index: 0, kind: input, shape index: {}]   ;;  %s41_s1 = inlined_call_operand.vmem [shape: f32[32,8], index: 1, kind: output, shape index: {}]  }
   0x1   :  { %v4_v0 = vld [vmem:[%s40_s0] ss:$0 sm:$0xff] }
   0x2   :  { %5 = vst [vmem:[%s41_s1] sm:$0xff] %v4_v0 }
   0x3   :  { %12 = vst [vmem:[%s41_s1 + $0x8] sm:$0xff] %v4_v0 }
   0x4   :  { %13 = vst [vmem:[%s41_s1 + $0x10] sm:$0xff] %v4_v0 }
   0x5   :  { %14 = vst [vmem:[%s41_s1 + $0x18] sm:$0xff] %v4_v0 }

// kernel: tile.14
= control target key start
LH: loop header
LB: loop body
LE: loop exit
PB: predicated region body
PF: predicated region fallthrough
CT: control target
= control target key end

     0   :  { %s7_s6 = smov 3  ;;  %s21_s9 = smov 3  ;;  %vm4_vm0 = vcmask 64512   ;;  %vm11_vm1 = vcmask 1048512   ;;  %vm18_vm2 = vcmask 982912   ;;  %vm25_vm3 = vcmask 917312   ;;  %s233_s0 = inlined_call_operand.vmem [shape: f32[32,8], index: 0, kind: input, shape index: {}]   ;;  %s234_s1 = inlined_call_operand.vmem [shape: f32[1,256], index: 1, kind: output, shape index: {}]  }
   0x1   :  { %v123_v0 = vld [vmem:[%s233_s0 + $0xf] ss:$16 sm:%s7_s6]   ;;  %s154_s10 = smov 120   ;;  %v125_v1 = vld [vmem:[%s233_s0 + $0xd] ss:$16 sm:%s21_s9]   ;;  %s155_s13 = smov 104  }
   0x2   :  { %9 = vrot.lane.b32.xlu0 %v123_v0, %s154_s10  ;;  %23 = vrot.lane.b32.xlu1 %v125_v1, %s155_s13  ;;  %s14_s14 = smov 3  ;;  %s28_s15 = smov 3  ;;  %vm32_vm4 = vcmask 851712   ;;  %vm39_vm5 = vcmask 786112   ;;  %vm46_vm6 = vcmask 720512   ;;  %vm53_vm7 = vcmask 654912  }
   0x3   :  { %v124_v2 = vld [vmem:[%s233_s0 + $0xe] ss:$16 sm:%s14_s14]   ;;  %v126_v3 = vld [vmem:[%s233_s0 + $0xc] ss:$16 sm:%s28_s15]   ;;  %s35_s20 = smov 3  ;;  %s156_s23 = smov 112  }
   0x4   :  { %v127_v4 = vld [vmem:[%s233_s0 + $0xb] ss:$16 sm:%s35_s20]   ;;  %s157_s24 = smov 88   ;;  %s158_s25 = smov 96   ;;  %vm60_vm8 = vcmask 589312   ;;  %vm67_vm9 = vcmask 523712  }
   0x5   :  { %37 = vrot.lane.b32.xlu2 %v127_v4, %s157_s24  ;;  %s49_s26 = smov 3  ;;  %s42_s27 = smov 3  ;;  %vm74_vm10 = vcmask 458112   ;;  %vm81_vm11 = vcmask 392512   ;;  %vm88_vm12 = vcmask 326912   ;;  %vm95_vm13 = vcmask 261312  }
   0x6   :  { %s56_s28 = smov 3  ;;  %v129_v5 = vld [vmem:[%s233_s0 + $0x9] ss:$16 sm:%s49_s26]   ;;  %v128_v6 = vld [vmem:[%s233_s0 + $0xa] ss:$16 sm:%s42_s27]   ;;  %s159_s6 = smov 72  }
   0x7   :  { %v130_v7 = vld [vmem:[%s233_s0 + $0x8] ss:$16 sm:%s56_s28]   ;;  %s160_s7 = smov 80   ;;  %s161_s8 = smov 64   ;;  %vm102_vm14 = vcmask 195712   ;;  %vm109_vm15 = vcmask 130112  }
   0x8   :  { %s70_s9 = smov 3  ;;  %s63_s10 = smov 3 }
   0x9   :  { %s77_s11 = smov 3  ;;  %v132_v8 = vld [vmem:[%s233_s0 + $0x6] ss:$16 sm:%s70_s9]   ;;  %v131_v9 = vld [vmem:[%s233_s0 + $0x7] ss:$16 sm:%s63_s10]   ;;  %s162_s18 = smov 48  }
   0xa   :  { %16 = vrot.lane.b32.xlu0 %v124_v2, %s156_s23  ;;  %30 = vrot.lane.b32.xlu1 %v126_v3, %s158_s25  ;;  %v133_v10 = vld [vmem:[%s233_s0 + $0x5] ss:$16 sm:%s77_s11]   ;;  %s163_s19 = smov 56   ;;  %s164_s20 = smov 40  }
   0xb   :  { %s91_s21 = smov 3  ;;  %s84_s22 = smov 3 }
   0xc   :  { %s98_s23 = smov 3  ;;  %v135_v11 = vld [vmem:[%s233_s0 + $0x3] ss:$16 sm:%s91_s21]   ;;  %v134_v12 = vld [vmem:[%s233_s0 + $0x4] ss:$16 sm:%s84_s22]   ;;  %s165_s30 = smov 24  }
   0xd   :  { %44 = vrot.lane.b32.xlu2 %v128_v6, %s160_s7  ;;  %v136_v13 = vld [vmem:[%s233_s0 + $0x2] ss:$16 sm:%s98_s23]   ;;  %s166_s2 = smov 32   ;;  %s167_s3 = smov 16  }
   0xe   :  { %s105_s4 = smov 3  ;;  %s168_s7 = smov 8  }
   0xf   :  { %v137_v14 = vld [vmem:[%s233_s0 + $0x1] ss:$16 sm:%s105_s4]  }
  0x12   :  { %51 = vrot.lane.b32.xlu0 %v129_v5, %s159_s6  ;;  %58 = vrot.lane.b32.xlu1 %v130_v7, %s161_s8  ;;  %s2_s8 = smov 3 }
  0x13   :  { %v3_v15 = vld [vmem:[%s233_s0] ss:$16 sm:%s2_s8]  }
  0x14   :  { %5 = vst.msk [vmem:[#allocation0] ss:$8 sm:$0x3] %vm4_vm0, %v3_v15  }
  0x15   :  { %65 = vrot.lane.b32.xlu2 %v131_v9, %s163_s19 }
  0x1a   :  { %72 = vrot.lane.b32.xlu0 %v132_v8, %s162_s18  ;;  %79 = vrot.lane.b32.xlu1 %v133_v10, %s164_s20 }
  0x1d   :  { %86 = vrot.lane.b32.xlu2 %v134_v12, %s166_s2 }
  0x22   :  { %93 = vrot.lane.b32.xlu0 %v135_v11, %s165_s30  ;;  %100 = vrot.lane.b32.xlu1 %v136_v13, %s167_s3 }
  0x25   :  { %107 = vrot.lane.b32.xlu2 %v137_v14, %s168_s7 }
  0x5f   :  { %v38_v16 = vpop.permute.xlu2 %37  }
  0x67   :  { %v45_v17 = vpop.permute.xlu2 %44  }
  0x6f   :  { %v66_v19 = vpop.permute.xlu2 %65  }
  0x74   :  { %v10_v18 = vpop.permute.xlu0 %9   ;;  %v24_v20 = vpop.permute.xlu1 %23  }
  0x75   :  { %12 = vst.msk [vmem:[#allocation0] ss:$8 sm:$0x3] %vm11_vm1, %v10_v18  }
  0x77   :  { %v87_v22 = vpop.permute.xlu2 %86  }
  0x7c   :  { %v17_v21 = vpop.permute.xlu0 %16   ;;  %v31_v23 = vpop.permute.xlu1 %30  }
  0x7d   :  { %19 = vst.msk [vmem:[#allocation0] ss:$8 sm:$0x3] %vm18_vm2, %v17_v21  }
  0x7e   :  { %26 = vst.msk [vmem:[#allocation0] ss:$8 sm:$0x3] %vm25_vm3, %v24_v20  }
  0x7f   :  { %33 = vst.msk [vmem:[#allocation0] ss:$8 sm:$0x3] %vm32_vm4, %v31_v23   ;;  %v108_v25 = vpop.permute.xlu2 %107  }
  0x80   :  { %40 = vst.msk [vmem:[#allocation0] ss:$8 sm:$0x3] %vm39_vm5, %v38_v16  }
  0x81   :  { %47 = vst.msk [vmem:[#allocation0] ss:$8 sm:$0x3] %vm46_vm6, %v45_v17  }
  0x84   :  { %v52_v24 = vpop.permute.xlu0 %51   ;;  %v59_v26 = vpop.permute.xlu1 %58  }
  0x85   :  { %54 = vst.msk [vmem:[#allocation0] ss:$8 sm:$0x3] %vm53_vm7, %v52_v24  }
  0x86   :  { %61 = vst.msk [vmem:[#allocation0] ss:$8 sm:$0x3] %vm60_vm8, %v59_v26  }
  0x87   :  { %68 = vst.msk [vmem:[#allocation0] ss:$8 sm:$0x3] %vm67_vm9, %v66_v19  }
  0x8c   :  { %v73_v27 = vpop.permute.xlu0 %72   ;;  %v80_v28 = vpop.permute.xlu1 %79  }
  0x8d   :  { %75 = vst.msk [vmem:[#allocation0] ss:$8 sm:$0x3] %vm74_vm10, %v73_v27  }
  0x8e   :  { %82 = vst.msk [vmem:[#allocation0] ss:$8 sm:$0x3] %vm81_vm11, %v80_v28  }
  0x8f   :  { %89 = vst.msk [vmem:[#allocation0] ss:$8 sm:$0x3] %vm88_vm12, %v87_v22  }
  0x94   :  { %v94_v29 = vpop.permute.xlu0 %93   ;;  %v101_v30 = vpop.permute.xlu1 %100  }
  0x95   :  { %96 = vst.msk [vmem:[#allocation0] ss:$8 sm:$0x3] %vm95_vm13, %v94_v29  }
  0x96   :  { %103 = vst.msk [vmem:[#allocation0] ss:$8 sm:$0x3] %vm102_vm14, %v101_v30  }
  0x97   :  { %110 = vst.msk [vmem:[#allocation0] ss:$8 sm:$0x3] %vm109_vm15, %v108_v25  }
  0x9e   :  { %v113_v31 = vld [vmem:[#allocation0] sm:$0x1]  ;;  %v118_v32 = vld [vmem:[#allocation0 + $0x8] sm:$0x1] }
  0x9f   :  { %116 = vst [vmem:[%s234_s1] sm:$0x1] %v113_v31 }
  0xa0   :  { %138 = vst [vmem:[%s234_s1 + $0x1] sm:$0x1] %v118_v32 }

// kernel: tile.18
= control target key start
LH: loop header
LB: loop body
LE: loop exit
PB: predicated region body
PF: predicated region fallthrough
CT: control target
= control target key end

     0   :  { %s40_s0 = inlined_call_operand.vmem [shape: f32[4], index: 0, kind: input, shape index: {}]   ;;  %s41_s1 = inlined_call_operand.vmem [shape: f32[32,4], index: 1, kind: output, shape index: {}]  }
   0x1   :  { %v4_v0 = vld [vmem:[%s40_s0] ss:$0 sm:$0xff] }
   0x2   :  { %5 = vst [vmem:[%s41_s1] sm:$0xff] %v4_v0 }
   0x3   :  { %12 = vst [vmem:[%s41_s1 + $0x8] sm:$0xff] %v4_v0 }
   0x4   :  { %13 = vst [vmem:[%s41_s1 + $0x10] sm:$0xff] %v4_v0 }
   0x5   :  { %14 = vst [vmem:[%s41_s1 + $0x18] sm:$0xff] %v4_v0 }

// kernel: tile.19
= control target key start
LH: loop header
LB: loop body
LE: loop exit
PB: predicated region body
PF: predicated region fallthrough
CT: control target
= control target key end

     0   :  { %s259_s10 = smov 124   ;;  %s260_s11 = smov 116   ;;  %vm3_vm0 = vcmask 31744   ;;  %vm9_vm1 = vcmask 1048544   ;;  %vm15_vm2 = vcmask 1015744   ;;  %vm21_vm3 = vcmask 982944   ;;  %s399_s0 = inlined_call_operand.vmem [shape: f32[32,4], index: 0, kind: input, shape index: {}]   ;;  %s400_s1 = inlined_call_operand.vmem [shape: f32[1,128], index: 1, kind: output, shape index: {}]  }
   0x1   :  { %v197_v0 = vld [vmem:[%s399_s0 + $0x1f] sm:$0x1]   ;;  %v199_v1 = vld [vmem:[%s399_s0 + $0x1d] sm:$0x1]   ;;  %v201_v2 = vld [vmem:[%s399_s0 + $0x1b] sm:$0x1]  }
   0x2   :  { %7 = vrot.lane.b32.xlu0 %v197_v0, %s259_s10  ;;  %19 = vrot.lane.b32.xlu1 %v199_v1, %s260_s11  ;;  %s261_s14 = smov 108   ;;  %v198_v3 = vld [vmem:[%s399_s0 + $0x1e] sm:$0x1]   ;;  %v200_v4 = vld [vmem:[%s399_s0 + $0x1c] sm:$0x1]   ;;  %s262_s19 = smov 120  }
   0x3   :  { %31 = vrot.lane.b32.xlu2 %v201_v2, %s261_s14  ;;  %s263_s20 = smov 112   ;;  %v202_v5 = vld [vmem:[%s399_s0 + $0x1a] sm:$0x1]   ;;  %s264_s23 = smov 104   ;;  %v203_v6 = vld [vmem:[%s399_s0 + $0x19] sm:$0x1]  }
   0x4   :  { %v204_v7 = vld [vmem:[%s399_s0 + $0x18] sm:$0x1]   ;;  %s265_s28 = smov 100   ;;  %s266_s29 = smov 96   ;;  %v205_v8 = vld [vmem:[%s399_s0 + $0x17] sm:$0x1]  }
   0x5   :  { %s267_s3 = smov 92   ;;  %v206_v9 = vld [vmem:[%s399_s0 + $0x16] sm:$0x1]   ;;  %v207_v10 = vld [vmem:[%s399_s0 + $0x15] sm:$0x1]   ;;  %s268_s8 = smov 88  }
   0x6   :  { %s269_s9 = smov 84   ;;  %v208_v11 = vld [vmem:[%s399_s0 + $0x14] sm:$0x1]   ;;  %s270_s12 = smov 80   ;;  %v209_v12 = vld [vmem:[%s399_s0 + $0x13] sm:$0x1]  }
   0x7   :  { %v210_v13 = vld [vmem:[%s399_s0 + $0x12] sm:$0x1]   ;;  %s271_s17 = smov 76   ;;  %s272_s18 = smov 72   ;;  %v211_v14 = vld [vmem:[%s399_s0 + $0x11] sm:$0x1]  }
   0x8   :  { %s273_s21 = smov 68   ;;  %v212_v15 = vld [vmem:[%s399_s0 + $0x10] sm:$0x1]   ;;  %v213_v16 = vld [vmem:[%s399_s0 + $0xf] sm:$0x1]   ;;  %s274_s26 = smov 64  }
   0x9   :  { %s275_s27 = smov 60   ;;  %v214_v17 = vld [vmem:[%s399_s0 + $0xe] sm:$0x1]   ;;  %s276_s30 = smov 56   ;;  %v215_v18 = vld [vmem:[%s399_s0 + $0xd] sm:$0x1]  }
   0xa   :  { %13 = vrot.lane.b32.xlu0 %v198_v3, %s262_s19  ;;  %25 = vrot.lane.b32.xlu1 %v200_v4, %s263_s20  ;;  %v216_v19 = vld [vmem:[%s399_s0 + $0xc] sm:$0x1]   ;;  %s277_s6 = smov 52   ;;  %s278_s7 = smov 48   ;;  %v217_v20 = vld [vmem:[%s399_s0 + $0xb] sm:$0x1]  }
   0xb   :  { %37 = vrot.lane.b32.xlu2 %v202_v5, %s264_s23  ;;  %s279_s10 = smov 44   ;;  %v218_v21 = vld [vmem:[%s399_s0 + $0xa] sm:$0x1]   ;;  %v219_v22 = vld [vmem:[%s399_s0 + $0x9] sm:$0x1]   ;;  %s280_s15 = smov 40  }
   0xc   :  { %s281_s16 = smov 36   ;;  %v220_v23 = vld [vmem:[%s399_s0 + $0x8] sm:$0x1]   ;;  %s282_s19 = smov 32   ;;  %v221_v24 = vld [vmem:[%s399_s0 + $0x7] sm:$0x1]  }
   0xd   :  { %v222_v25 = vld [vmem:[%s399_s0 + $0x6] sm:$0x1]   ;;  %s283_s24 = smov 28   ;;  %s284_s25 = smov 24   ;;  %v223_v26 = vld [vmem:[%s399_s0 + $0x5] sm:$0x1]  }
   0xe   :  { %v224_v27 = vld [vmem:[%s399_s0 + $0x4] sm:$0x1]   ;;  %v225_v28 = vld [vmem:[%s399_s0 + $0x3] sm:$0x1]   ;;  %s286_s4 = smov 16   ;;  %s287_s5 = smov 12  }
   0xf   :  { %v226_v29 = vld [vmem:[%s399_s0 + $0x2] sm:$0x1]   ;;  %v227_v30 = vld [vmem:[%s399_s0 + $0x1] sm:$0x1]   ;;  %s289_s11 = smov 4   ;;  %vm27_vm4 = vcmask 950144  }
  0x10   :  { %v2_v31 = vld [vmem:[%s399_s0] sm:$0x1]   ;;  %vm33_vm5 = vcmask 917344   ;;  %vm39_vm6 = vcmask 884544   ;;  %vm45_vm7 = vcmask 851744   ;;  %vm51_vm8 = vcmask 818944  }
  0x11   :  { %4 = vst.msk [vmem:[#allocation0] sm:$0x1] %vm3_vm0, %v2_v31   ;;  %vm57_vm9 = vcmask 786144   ;;  %vm63_vm10 = vcmask 753344   ;;  %vm69_vm11 = vcmask 720544   ;;  %vm75_vm12 = vcmask 687744  }
  0x12   :  { %43 = vrot.lane.b32.xlu0 %v203_v6, %s265_s28  ;;  %49 = vrot.lane.b32.xlu1 %v204_v7, %s266_s29  ;;  %s285_s28 = smov 20   ;;  %vm81_vm13 = vcmask 654944   ;;  %vm87_vm14 = vcmask 622144   ;;  %vm93_vm15 = vcmask 589344   ;;  %vm99_vm0 = vcmask 556544  }
  0x13   :  { %55 = vrot.lane.b32.xlu2 %v205_v8, %s267_s3 }
  0x1a   :  { %61 = vrot.lane.b32.xlu0 %v206_v9, %s268_s8  ;;  %67 = vrot.lane.b32.xlu1 %v207_v10, %s269_s9  ;;  %s288_s8 = smov 8  }
  0x1b   :  { %73 = vrot.lane.b32.xlu2 %v208_v11, %s270_s12 }
  0x22   :  { %79 = vrot.lane.b32.xlu0 %v209_v12, %s271_s17  ;;  %85 = vrot.lane.b32.xlu1 %v210_v13, %s272_s18 }
  0x23   :  { %91 = vrot.lane.b32.xlu2 %v211_v14, %s273_s21 }
  0x2a   :  { %97 = vrot.lane.b32.xlu0 %v212_v15, %s274_s26  ;;  %103 = vrot.lane.b32.xlu1 %v213_v16, %s275_s27 }
  0x2b   :  { %109 = vrot.lane.b32.xlu2 %v214_v17, %s276_s30 }
  0x32   :  { %115 = vrot.lane.b32.xlu0 %v215_v18, %s277_s6  ;;  %121 = vrot.lane.b32.xlu1 %v216_v19, %s278_s7 }
  0x33   :  { %127 = vrot.lane.b32.xlu2 %v217_v20, %s279_s10 }
  0x3a   :  { %133 = vrot.lane.b32.xlu0 %v218_v21, %s280_s15  ;;  %139 = vrot.lane.b32.xlu1 %v219_v22, %s281_s16 }
  0x3b   :  { %145 = vrot.lane.b32.xlu2 %v220_v23, %s282_s19 }
  0x42   :  { %151 = vrot.lane.b32.xlu0 %v221_v24, %s283_s24  ;;  %157 = vrot.lane.b32.xlu1 %v222_v25, %s284_s25 }
  0x43   :  { %163 = vrot.lane.b32.xlu2 %v223_v26, %s285_s28 }
  0x4a   :  { %169 = vrot.lane.b32.xlu0 %v224_v27, %s286_s4  ;;  %175 = vrot.lane.b32.xlu1 %v225_v28, %s287_s5 }
  0x4b   :  { %181 = vrot.lane.b32.xlu2 %v226_v29, %s288_s8 }
  0x52   :  { %187 = vrot.lane.b32.xlu0 %v227_v30, %s289_s11 }
  0x5d   :  { %v32_v32 = vpop.permute.xlu2 %31  }
  0x65   :  { %v38_v33 = vpop.permute.xlu2 %37  }
  0x6d   :  { %v56_v34 = vpop.permute.xlu2 %55  }
  0x74   :  { %v8_v35 = vpop.permute.xlu0 %7   ;;  %v20_v36 = vpop.permute.xlu1 %19  }
  0x75   :  { %10 = vst.msk [vmem:[#allocation0] sm:$0x1] %vm9_vm1, %v8_v35   ;;  %v74_v37 = vpop.permute.xlu2 %73   ;;  %vm105_vm1 = vcmask 523744  }
  0x7c   :  { %v14_v38 = vpop.permute.xlu0 %13   ;;  %v26_v39 = vpop.permute.xlu1 %25  }
  0x7d   :  { %16 = vst.msk [vmem:[#allocation0] sm:$0x1] %vm15_vm2, %v14_v38   ;;  %v92_v40 = vpop.permute.xlu2 %91   ;;  %vm111_vm2 = vcmask 490944  }
  0x7e   :  { %22 = vst.msk [vmem:[#allocation0] sm:$0x1] %vm21_vm3, %v20_v36   ;;  %vm117_vm3 = vcmask 458144  }
  0x7f   :  { %28 = vst.msk [vmem:[#allocation0] sm:$0x1] %vm27_vm4, %v26_v39   ;;  %vm123_vm4 = vcmask 425344  }
  0x80   :  { %34 = vst.msk [vmem:[#allocation0] sm:$0x1] %vm33_vm5, %v32_v32   ;;  %vm129_vm5 = vcmask 392544  }
  0x81   :  { %40 = vst.msk [vmem:[#allocation0] sm:$0x1] %vm39_vm6, %v38_v33   ;;  %vm135_vm6 = vcmask 359744  }
  0x84   :  { %v44_v41 = vpop.permute.xlu0 %43   ;;  %v50_v42 = vpop.permute.xlu1 %49  }
  0x85   :  { %46 = vst.msk [vmem:[#allocation0] sm:$0x1] %vm45_vm7, %v44_v41   ;;  %v110_v43 = vpop.permute.xlu2 %109   ;;  %vm141_vm7 = vcmask 326944  }
  0x86   :  { %52 = vst.msk [vmem:[#allocation0] sm:$0x1] %vm51_vm8, %v50_v42   ;;  %vm147_vm8 = vcmask 294144  }
  0x87   :  { %58 = vst.msk [vmem:[#allocation0] sm:$0x1] %vm57_vm9, %v56_v34   ;;  %vm153_vm9 = vcmask 261344  }
  0x8c   :  { %v62_v44 = vpop.permute.xlu0 %61   ;;  %v68_v45 = vpop.permute.xlu1 %67  }
  0x8d   :  { %64 = vst.msk [vmem:[#allocation0] sm:$0x1] %vm63_vm10, %v62_v44   ;;  %v128_v46 = vpop.permute.xlu2 %127   ;;  %vm159_vm10 = vcmask 228544  }
  0x8e   :  { %70 = vst.msk [vmem:[#allocation0] sm:$0x1] %vm69_vm11, %v68_v45   ;;  %vm165_vm11 = vcmask 195744  }
  0x8f   :  { %76 = vst.msk [vmem:[#allocation0] sm:$0x1] %vm75_vm12, %v74_v37   ;;  %vm171_vm12 = vcmask 162944  }
  0x94   :  { %v80_v47 = vpop.permute.xlu0 %79   ;;  %v86_v48 = vpop.permute.xlu1 %85  }
  0x95   :  { %82 = vst.msk [vmem:[#allocation0] sm:$0x1] %vm81_vm13, %v80_v47   ;;  %v146_v49 = vpop.permute.xlu2 %145   ;;  %vm177_vm13 = vcmask 130144  }
  0x96   :  { %88 = vst.msk [vmem:[#allocation0] sm:$0x1] %vm87_vm14, %v86_v48   ;;  %vm183_vm14 = vcmask 97344  }
  0x97   :  { %94 = vst.msk [vmem:[#allocation0] sm:$0x1] %vm93_vm15, %v92_v40   ;;  %vm189_vm15 = vcmask 64544  }
  0x9c   :  { %v98_v50 = vpop.permute.xlu0 %97   ;;  %v104_v51 = vpop.permute.xlu1 %103  }
  0x9d   :  { %100 = vst.msk [vmem:[#allocation0] sm:$0x1] %vm99_vm0, %v98_v50   ;;  %v164_v52 = vpop.permute.xlu2 %163  }
  0x9e   :  { %106 = vst.msk [vmem:[#allocation0] sm:$0x1] %vm105_vm1, %v104_v51  }
  0x9f   :  { %112 = vst.msk [vmem:[#allocation0] sm:$0x1] %vm111_vm2, %v110_v43  }
  0xa4   :  { %v116_v53 = vpop.permute.xlu0 %115   ;;  %v122_v54 = vpop.permute.xlu1 %121  }
  0xa5   :  { %118 = vst.msk [vmem:[#allocation0] sm:$0x1] %vm117_vm3, %v116_v53   ;;  %v182_v55 = vpop.permute.xlu2 %181  }
  0xa6   :  { %124 = vst.msk [vmem:[#allocation0] sm:$0x1] %vm123_vm4, %v122_v54  }
  0xa7   :  { %130 = vst.msk [vmem:[#allocation0] sm:$0x1] %vm129_vm5, %v128_v46  }
  0xac   :  { %v134_v56 = vpop.permute.xlu0 %133   ;;  %v140_v57 = vpop.permute.xlu1 %139  }
  0xad   :  { %136 = vst.msk [vmem:[#allocation0] sm:$0x1] %vm135_vm6, %v134_v56  }
  0xae   :  { %142 = vst.msk [vmem:[#allocation0] sm:$0x1] %vm141_vm7, %v140_v57  }
  0xaf   :  { %148 = vst.msk [vmem:[#allocation0] sm:$0x1] %vm147_vm8, %v146_v49  }
  0xb4   :  { %v152_v58 = vpop.permute.xlu0 %151   ;;  %v158_v59 = vpop.permute.xlu1 %157  }
  0xb5   :  { %154 = vst.msk [vmem:[#allocation0] sm:$0x1] %vm153_vm9, %v152_v58  }
  0xb6   :  { %160 = vst.msk [vmem:[#allocation0] sm:$0x1] %vm159_vm10, %v158_v59  }
  0xb7   :  { %166 = vst.msk [vmem:[#allocation0] sm:$0x1] %vm165_vm11, %v164_v52  }
  0xbc   :  { %v170_v60 = vpop.permute.xlu0 %169   ;;  %v176_v61 = vpop.permute.xlu1 %175  }
  0xbd   :  { %172 = vst.msk [vmem:[#allocation0] sm:$0x1] %vm171_vm12, %v170_v60  }
  0xbe   :  { %178 = vst.msk [vmem:[#allocation0] sm:$0x1] %vm177_vm13, %v176_v61  }
  0xbf   :  { %184 = vst.msk [vmem:[#allocation0] sm:$0x1] %vm183_vm14, %v182_v55  }
  0xc4   :  { %v188_v62 = vpop.permute.xlu0 %187  }
  0xc5   :  { %190 = vst.msk [vmem:[#allocation0] sm:$0x1] %vm189_vm15, %v188_v62  }
  0xcc   :  { %v193_v63 = vld [vmem:[#allocation0] sm:$0x1] }
  0xcd   :  { %196 = vst [vmem:[%s400_s1] sm:$0x1] %v193_v63 }

// kernel: autoencoder_forward_pallas.1
= control target key start
LH: loop header
LB: loop body
LE: loop exit
PB: predicated region body
PF: predicated region fallthrough
CT: control target
= control target key end

     0   :  { %vm497_vm6 = vcmask 1040384   ;;  %vm536_vm7 = vcmask 1045504   ;;  %s2171_s1 = inlined_call_operand.vmem [shape: bf16[3,128,256], index: 1, kind: input, shape index: {}]   ;;  %s2172_s0 = inlined_call_operand.vmem [shape: bf16[16,128], index: 0, kind: input, shape index: {}]   ;;  %s2173_s3 = inlined_call_operand.vmem [shape: bf16[3,256,128], index: 3, kind: input, shape index: {}]   ;;  %s2174_s2 = inlined_call_operand.vmem [shape: f32[1,256], index: 2, kind: input, shape index: {}]   ;;  %s2175_s4 = inlined_call_operand.vmem [shape: f32[1,128], index: 4, kind: input, shape index: {}]   ;;  %s2176_s5 = inlined_call_operand.vmem [shape: f32[16,128], index: 5, kind: output, shape index: {}]  }
   0x1   :  { %v1118_v0 = vld [vmem:[%s2171_s1 + $0xf0] sm:$0xf]  ;;  %v1580_v1 = vld [vmem:[%s2171_s1 + $0xf4] sm:$0xf0]  ;;  %v1579_v2 = vld [vmem:[%s2171_s1 + $0xf4] sm:$0xf] }
   0x2   :  { %v1119_v3 = vor.u32 %v1580_v1, %v1118_v0  ;;  %v1120_v4 = vld [vmem:[%s2171_s1 + $0xf8] sm:$0xf0]  ;;  %v1182_v5 = vld [vmem:[%s2171_s1 + $0x70] sm:$0xf]  ;;  %v1564_v6 = vld [vmem:[%s2171_s1 + $0x74] sm:$0xf0] }
   0x3   :  { %v1123_v7 = vor.u32 %v1579_v2, %v1120_v4  ;;  %v1183_v8 = vor.u32 %v1564_v6, %v1182_v5  ;;  %v1563_v9 = vld [vmem:[%s2171_s1 + $0x74] sm:$0xf]  ;;  %v1184_v10 = vld [vmem:[%s2171_s1 + $0x78] sm:$0xf0]  ;;  %v1110_v11 = vld [vmem:[%s2171_s1 + $0xe0] sm:$0xf]  ;;  %v33_v4 = vlaneseq }
   0x4   :  { %208 = vmatpush.bf16.msra.mxu0 %v1119_v3  ;;  %v1187_v12 = vor.u32 %v1563_v9, %v1184_v10  ;;  %v1578_v13 = vld [vmem:[%s2171_s1 + $0xe4] sm:$0xf0]  ;;  %v1577_v14 = vld [vmem:[%s2171_s1 + $0xe4] sm:$0xf]  ;;  %v1112_v15 = vld [vmem:[%s2171_s1 + $0xe8] sm:$0xf0] }
   0x5   :  { %222 = vmatpush.bf16.msra.mxu1 %v1123_v7  ;;  %316 = vmatpush.bf16.msra.mxu2 %v1183_v8  ;;  %v1111_v16 = vor.u32 %v1578_v13, %v1110_v11  ;;  %v1115_v17 = vor.u32 %v1577_v14, %v1112_v15  ;;  %v1174_v18 = vld [vmem:[%s2171_s1 + $0x60] sm:$0xf]  ;;  %v1562_v19 = vld [vmem:[%s2171_s1 + $0x64] sm:$0xf0]  ;;  %v1561_v20 = vld [vmem:[%s2171_s1 + $0x64] sm:$0xf] }
   0x6   :  { %330 = vmatpush.bf16.msra.mxu3 %v1187_v12  ;;  %v1175_v21 = vor.u32 %v1562_v19, %v1174_v18  ;;  %v1176_v22 = vld [vmem:[%s2171_s1 + $0x68] sm:$0xf0]  ;;  %v1102_v23 = vld [vmem:[%s2171_s1 + $0xd0] sm:$0xf]  ;;  %v1576_v24 = vld [vmem:[%s2171_s1 + $0xd4] sm:$0xf0] }
   0x7   :  { %v1179_v25 = vor.u32 %v1561_v20, %v1176_v22  ;;  %v1575_v26 = vld [vmem:[%s2171_s1 + $0xd4] sm:$0xf]  ;;  %v1104_v27 = vld [vmem:[%s2171_s1 + $0xd8] sm:$0xf0]  ;;  %v1166_v28 = vld [vmem:[%s2171_s1 + $0x50] sm:$0xf]  ;;  %v1103_v29 = vor.u32 %v1576_v24, %v1102_v23 }
   0x8   :  { %209 = vmatpush.bf16.msra.mxu0 %v1111_v16  ;;  %v1560_v30 = vld [vmem:[%s2171_s1 + $0x54] sm:$0xf0]  ;;  %v1559_v31 = vld [vmem:[%s2171_s1 + $0x54] sm:$0xf]  ;;  %v1168_v32 = vld [vmem:[%s2171_s1 + $0x58] sm:$0xf0]  ;;  %v1107_v33 = vor.u32 %v1575_v26, %v1104_v27 }
   0x9   :  { %223 = vmatpush.bf16.msra.mxu1 %v1115_v17  ;;  %317 = vmatpush.bf16.msra.mxu2 %v1175_v21  ;;  %v1167_v34 = vor.u32 %v1560_v30, %v1166_v28  ;;  %v1094_v35 = vld [vmem:[%s2171_s1 + $0xc0] sm:$0xf]  ;;  %v1574_v36 = vld [vmem:[%s2171_s1 + $0xc4] sm:$0xf0]  ;;  %v1573_v37 = vld [vmem:[%s2171_s1 + $0xc4] sm:$0xf]  ;;  %v1171_v38 = vor.u32 %v1559_v31, %v1168_v32 }
   0xa   :  { %331 = vmatpush.bf16.msra.mxu3 %v1179_v25  ;;  %v1096_v39 = vld [vmem:[%s2171_s1 + $0xc8] sm:$0xf0]  ;;  %v1158_v40 = vld [vmem:[%s2171_s1 + $0x40] sm:$0xf]  ;;  %v1558_v41 = vld [vmem:[%s2171_s1 + $0x44] sm:$0xf0]  ;;  %v1095_v44 = vor.u32 %v1574_v36, %v1094_v35 }
   0xb   :  { %v1557_v42 = vld [vmem:[%s2171_s1 + $0x44] sm:$0xf]  ;;  %v1160_v43 = vld [vmem:[%s2171_s1 + $0x48] sm:$0xf0]  ;;  %v1099_v45 = vor.u32 %v1573_v37, %v1096_v39  ;;  %v1159_v46 = vor.u32 %v1558_v41, %v1158_v40  ;;  %v1086_v47 = vld [vmem:[%s2171_s1 + $0xb0] sm:$0xf] }
   0xc   :  { %210 = vmatpush.bf16.msra.mxu0 %v1103_v29  ;;  %v1572_v48 = vld [vmem:[%s2171_s1 + $0xb4] sm:$0xf0]  ;;  %v1571_v49 = vld [vmem:[%s2171_s1 + $0xb4] sm:$0xf]  ;;  %v1163_v50 = vor.u32 %v1557_v42, %v1160_v43  ;;  %v1088_v51 = vld [vmem:[%s2171_s1 + $0xb8] sm:$0xf0] }
   0xd   :  { %224 = vmatpush.bf16.msra.mxu1 %v1107_v33  ;;  %318 = vmatpush.bf16.msra.mxu2 %v1167_v34  ;;  %v1150_v52 = vld [vmem:[%s2171_s1 + $0x30] sm:$0xf]  ;;  %v1556_v53 = vld [vmem:[%s2171_s1 + $0x34] sm:$0xf0]  ;;  %v1555_v54 = vld [vmem:[%s2171_s1 + $0x34] sm:$0xf]  ;;  %v1087_v56 = vor.u32 %v1572_v48, %v1086_v47  ;;  %v1091_v57 = vor.u32 %v1571_v49, %v1088_v51 }
   0xe   :  { %332 = vmatpush.bf16.msra.mxu3 %v1171_v38  ;;  %v1152_v55 = vld [vmem:[%s2171_s1 + $0x38] sm:$0xf0]  ;;  %v1151_v58 = vor.u32 %v1556_v53, %v1150_v52  ;;  %v1078_v59 = vld [vmem:[%s2171_s1 + $0xa0] sm:$0xf]  ;;  %v1570_v60 = vld [vmem:[%s2171_s1 + $0xa4] sm:$0xf0] }
   0xf   :  { %v1569_v61 = vld [vmem:[%s2171_s1 + $0xa4] sm:$0xf]  ;;  %v1155_v62 = vor.u32 %v1555_v54, %v1152_v55  ;;  %v1080_v63 = vld [vmem:[%s2171_s1 + $0xa8] sm:$0xf0]  ;;  %v1142_v0 = vld [vmem:[%s2171_s1 + $0x20] sm:$0xf]  ;;  %v1079_v5 = vor.u32 %v1570_v60, %v1078_v59 }
  0x10   :  { %211 = vmatpush.bf16.msra.mxu0 %v1095_v44  ;;  %v1554_v1 = vld [vmem:[%s2171_s1 + $0x24] sm:$0xf0]  ;;  %v1553_v2 = vld [vmem:[%s2171_s1 + $0x24] sm:$0xf]  ;;  %v1144_v3 = vld [vmem:[%s2171_s1 + $0x28] sm:$0xf0]  ;;  %v1083_v8 = vor.u32 %v1569_v61, %v1080_v63 }
  0x11   :  { %225 = vmatpush.bf16.msra.mxu1 %v1099_v45  ;;  %319 = vmatpush.bf16.msra.mxu2 %v1159_v46  ;;  %v1070_v6 = vld [vmem:[%s2171_s1 + $0x90] sm:$0xf]  ;;  %v1568_v7 = vld [vmem:[%s2171_s1 + $0x94] sm:$0xf0]  ;;  %v1143_v9 = vor.u32 %v1554_v1, %v1142_v0  ;;  %v1567_v10 = vld [vmem:[%s2171_s1 + $0x94] sm:$0xf]  ;;  %v1147_v13 = vor.u32 %v1553_v2, %v1144_v3 }
  0x12   :  { %333 = vmatpush.bf16.msra.mxu3 %v1163_v50  ;;  %v1072_v11 = vld [vmem:[%s2171_s1 + $0x98] sm:$0xf0]  ;;  %v1134_v12 = vld [vmem:[%s2171_s1 + $0x10] sm:$0xf]  ;;  %v1552_v14 = vld [vmem:[%s2171_s1 + $0x14] sm:$0xf0]  ;;  %v1071_v21 = vor.u32 %v1568_v7, %v1070_v6 }
  0x13   :  { %v1551_v15 = vld [vmem:[%s2171_s1 + $0x14] sm:$0xf]  ;;  %v1136_v16 = vld [vmem:[%s2171_s1 + $0x18] sm:$0xf0]  ;;  %v1062_v17 = vld [vmem:[%s2171_s1 + $0x80] sm:$0xf]  ;;  %v1075_v22 = vor.u32 %v1567_v10, %v1072_v11  ;;  %v1135_v28 = vor.u32 %v1552_v14, %v1134_v12 }
  0x14   :  { %212 = vmatpush.bf16.msra.mxu0 %v1087_v56  ;;  %v1566_v18 = vld [vmem:[%s2171_s1 + $0x84] sm:$0xf0]  ;;  %v1647_v19 = vmov 0.0   ;;  %v1852_v20 = vshrl.u32 %v33_v4, 7  ;;  %v1565_v23 = vld [vmem:[%s2171_s1 + $0x84] sm:$0xf]  ;;  %v1139_v33 = vor.u32 %v1551_v15, %v1136_v16 }
  0x15   :  { %226 = vmatpush.bf16.msra.mxu1 %v1091_v57  ;;  %320 = vmatpush.bf16.msra.mxu2 %v1151_v58  ;;  %24 = vst [vmem:[#allocation2] sm:$0xff] %v1647_v19  ;;  %v1064_v24 = vld [vmem:[%s2171_s1 + $0x88] sm:$0xf0]  ;;  %v1126_v25 = vld [vmem:[%s2171_s1] sm:$0xf]  ;;  %v1063_v38 = vor.u32 %v1566_v18, %v1062_v17  ;;  %v1628_v63 = vld [vmem:[%s2173_s3 + $0xf8] sm:$0xff] }
  0x16   :  { %334 = vmatpush.bf16.msra.mxu3 %v1155_v62  ;;  %v1550_v26 = vld [vmem:[%s2171_s1 + $0x4] sm:$0xf0]  ;;  %25 = vst [vmem:[#allocation2 + $0x8] sm:$0xff] %v1647_v19  ;;  %v64_v27 = vld [vmem:[%s2172_s0] sm:$0xff]   ;;  %v1873_v30 = vadd.s32 8, %v1852_v20  ;;  %v40_v40 = vand.u32 7, %v1852_v20  ;;  %v1067_v42 = vor.u32 %v1565_v23, %v1064_v24 }
  0x17   :  { %v1549_v29 = vld [vmem:[%s2171_s1 + $0x4] sm:$0xf]  ;;  %26 = vst [vmem:[#allocation2 + $0x10] sm:$0x3] %v1647_v19  ;;  %v67_v31 = vunpack.c.l.bf16 %v64_v27  ;;  %v68_v32 = vunpack.c.h.bf16 %v64_v27  ;;  %v1128_v34 = vld [vmem:[%s2171_s1 + $0x8] sm:$0xf0]  ;;  %v1127_v43 = vor.u32 %v1550_v26, %v1126_v25 }
  0x18   :  { %213 = vmatpush.bf16.msra.mxu0 %v1079_v5  ;;  %v1268_v35 = vld [vmem:[%s2171_s1 + $0x170] sm:$0xf]  ;;  %27 = vst [vmem:[#allocation3 + $0x28] sm:$0xff] %v1647_v19  ;;  %v1596_v36 = vld [vmem:[%s2171_s1 + $0x174] sm:$0xf0]  ;;  %v47_v41 = vand.u32 7, %v1873_v30  ;;  %v1131_v44 = vor.u32 %v1549_v29, %v1128_v34 }
  0x19   :  { %227 = vmatpush.bf16.msra.mxu1 %v1083_v8  ;;  %321 = vmatpush.bf16.msra.mxu2 %v1143_v9  ;;  %v1595_v37 = vld [vmem:[%s2171_s1 + $0x174] sm:$0xf]  ;;  %69 = vst [vmem:[#allocation2 + $0x1] sm:$0xff] %v67_v31  ;;  %v1270_v39 = vld [vmem:[%s2171_s1 + $0x178] sm:$0xf0]  ;;  %v1269_v45 = vor.u32 %v1596_v36, %v1268_v35  ;;  %v1548_v49 = vld [vmem:[%s2172_s0] sm:$0xff] }
  0x1a   :  { %335 = vmatpush.bf16.msra.mxu3 %v1147_v13  ;;  %70 = vst [vmem:[#allocation2 + $0x9] sm:$0xff] %v68_v32  ;;  %v1260_v46 = vld [vmem:[%s2171_s1 + $0x160] sm:$0xf]  ;;  %v1273_v47 = vor.u32 %v1595_v37, %v1270_v39  ;;  %v1594_v48 = vld [vmem:[%s2171_s1 + $0x164] sm:$0xf0]  ;;  %vm60_vm0 = vcmp.ne.s32.totalorder %v40_v40, 0 }
  0x1b   :  { %28 = vst [vmem:[#allocation3 + $0x10] sm:$0xff] %v1647_v19  ;;  %vm61_vm1 = vcmp.ne.s32.totalorder %v47_v41, 0  ;;  %v1593_v50 = vld [vmem:[%s2171_s1 + $0x164] sm:$0xf]  ;;  %v1262_v51 = vld [vmem:[%s2171_s1 + $0x168] sm:$0xf0]  ;;  %v1261_v55 = vor.u32 %v1594_v48, %v1260_v46 }
  0x1c   :  { %214 = vmatpush.bf16.msra.mxu0 %v1071_v21  ;;  %31 = vst [vmem:[#allocation3 + $0x18] sm:$0x3] %v1647_v19  ;;  %vm1911_vm2 = vmpackc.low %vm61_vm1, %vm60_vm0  ;;  %v1265_v56 = vor.u32 %v1593_v50, %v1262_v51  ;;  %v1252_v57 = vld [vmem:[%s2171_s1 + $0x150] sm:$0xf]  ;;  %v1592_v59 = vld [vmem:[%s2171_s1 + $0x154] sm:$0xf0] }
  0x1d   :  { %228 = vmatpush.bf16.msra.mxu1 %v1075_v22  ;;  %322 = vmatpush.bf16.msra.mxu2 %v1135_v28  ;;  %32 = vst [vmem:[#allocation3 + $0x20] sm:$0x3] %v1647_v19  ;;  %v1591_v60 = vld [vmem:[%s2171_s1 + $0x154] sm:$0xf]  ;;  %v1254_v61 = vld [vmem:[%s2171_s1 + $0x158] sm:$0xf0]  ;;  %v1253_v0 = vor.u32 %v1592_v59, %v1252_v57 }
  0x1e   :  { %336 = vmatpush.bf16.msra.mxu3 %v1139_v33  ;;  %v1620_v62 = vld [vmem:[%s2173_s3 + $0xb8] sm:$0xff]  ;;  %v1257_v1 = vor.u32 %v1591_v60, %v1254_v61  ;;  %v1244_v2 = vld [vmem:[%s2171_s1 + $0x140] sm:$0xf]  ;;  %v1590_v3 = vld [vmem:[%s2171_s1 + $0x144] sm:$0xf0]  ;;  %vm62_vm3 = vcmp.ne.s32.totalorder %v40_v40, 7 }
  0x1f   :  { %v1589_v4 = vld [vmem:[%s2171_s1 + $0x144] sm:$0xf]  ;;  %v1246_v5 = vld [vmem:[%s2171_s1 + $0x148] sm:$0xf0]  ;;  %v1245_v6 = vor.u32 %v1590_v3, %v1244_v2  ;;  %v1236_v8 = vld [vmem:[%s2171_s1 + $0x130] sm:$0xf] }
  0x20   :  { %215 = vmatpush.bf16.msra.mxu0 %v1063_v38  ;;  %v71_v52 = vld [vmem:[#allocation2] sm:$0xff]  ;;  %v1249_v7 = vor.u32 %v1589_v4, %v1246_v5  ;;  %v1588_v9 = vld [vmem:[%s2171_s1 + $0x134] sm:$0xf0]  ;;  %v1587_v10 = vld [vmem:[%s2171_s1 + $0x134] sm:$0xf]  ;;  %vm63_vm4 = vcmp.ne.s32.totalorder %v47_v41, 7 }
  0x21   :  { %229 = vmatpush.bf16.msra.mxu1 %v1067_v42  ;;  %323 = vmatpush.bf16.msra.mxu2 %v1127_v43  ;;  %v72_v53 = vld [vmem:[#allocation2 + $0x8] sm:$0xff]  ;;  %v1238_v11 = vld [vmem:[%s2171_s1 + $0x138] sm:$0xf0]  ;;  %v1237_v12 = vor.u32 %v1588_v9, %v1236_v8  ;;  %v1228_v14 = vld [vmem:[%s2171_s1 + $0x120] sm:$0xf] }
  0x22   :  { %337 = vmatpush.bf16.msra.mxu3 %v1131_v44  ;;  %v1189_v58 = vpack.c.bf16 %v72_v53, %v71_v52  ;;  %v1241_v13 = vor.u32 %v1587_v10, %v1238_v11  ;;  %v1586_v15 = vld [vmem:[%s2171_s1 + $0x124] sm:$0xf0]  ;;  %v1585_v16 = vld [vmem:[%s2171_s1 + $0x124] sm:$0xf]  ;;  %v1230_v17 = vld [vmem:[%s2171_s1 + $0x128] sm:$0xf0] }
  0x23   :  { %216 = vmatmul.bf16.vlgmr.msra.gmra.mxu0 %v1548_v49  ;;  %v1229_v18 = vor.u32 %v1586_v15, %v1228_v14  ;;  %v1233_v19 = vor.u32 %v1585_v16, %v1230_v17  ;;  %v1220_v21 = vld [vmem:[%s2171_s1 + $0x110] sm:$0xf]  ;;  %v1584_v22 = vld [vmem:[%s2171_s1 + $0x114] sm:$0xf0]  ;;  %v1583_v23 = vld [vmem:[%s2171_s1 + $0x114] sm:$0xf] }
  0x24   :  { %441 = vmatpush.bf16.msrb.mxu0 %v1269_v45  ;;  %230 = vmatmul.bf16.vlgmr.msra.gmra.mxu1 %v1548_v49  ;;  %v1222_v24 = vld [vmem:[%s2171_s1 + $0x118] sm:$0xf0]  ;;  %v1221_v25 = vor.u32 %v1584_v22, %v1220_v21  ;;  %v1212_v27 = vld [vmem:[%s2171_s1 + $0x100] sm:$0xf]  ;;  %v1582_v28 = vld [vmem:[%s2171_s1 + $0x104] sm:$0xf0] }
  0x25   :  { %455 = vmatpush.bf16.msrb.mxu1 %v1273_v47  ;;  %1190 = vmatmul.msk.bf16.vlgmr.msra.gmra.mxu2 %vm1911_vm2, %v1189_v58  ;;  %v1225_v26 = vor.u32 %v1583_v23, %v1222_v24  ;;  %v1581_v29 = vld [vmem:[%s2171_s1 + $0x104] sm:$0xf]  ;;  %v1214_v31 = vld [vmem:[%s2171_s1 + $0x108] sm:$0xf0]  ;;  %v1213_v32 = vor.u32 %v1582_v28, %v1212_v27  ;;  %vm2001_vm5 = vmpackc.low %vm63_vm4, %vm62_vm3 }
  0x26   :  { %1193 = vmatmul.msk.bf16.vlgmr.msra.gmra.mxu3 %vm1911_vm2, %v1189_v58  ;;  %718 = vmatpush.bf16.msrb.mxu2 %v1620_v62  ;;  %v1217_v33 = vor.u32 %v1581_v29, %v1214_v31  ;;  %v80_v34 = vld [vmem:[#allocation2 + $0x2] sm:$0xff]  ;;  %v81_v35 = vld [vmem:[#allocation2 + $0xa] sm:$0xff]  ;;  %v1616_v42 = vld [vmem:[%s2173_s3 + $0x98] sm:$0xff] }
  0x27   :  { %732 = vmatpush.bf16.msrb.mxu3 %v1628_v63  ;;  %v1275_v36 = vpack.c.bf16 %v81_v35, %v80_v34  ;;  %v1619_v20 = vld [vmem:[%s2173_s3 + $0xb0] sm:$0xff]  ;;  %v1618_v38 = vld [vmem:[%s2173_s3 + $0xa8] sm:$0xff]  ;;  %v1617_v40 = vld [vmem:[%s2173_s3 + $0xa0] sm:$0xff] }
  0x28   :  { %442 = vmatpush.bf16.msrb.mxu0 %v1261_v55  ;;  %v1627_v30 = vld [vmem:[%s2173_s3 + $0xf0] sm:$0xff]  ;;  %v1626_v39 = vld [vmem:[%s2173_s3 + $0xe8] sm:$0xff]  ;;  %v1625_v41 = vld [vmem:[%s2173_s3 + $0xe0] sm:$0xff] }
  0x29   :  { %456 = vmatpush.bf16.msrb.mxu1 %v1265_v56  ;;  %v1624_v43 = vld [vmem:[%s2173_s3 + $0xd8] sm:$0xff]  ;;  %v1615_v44 = vld [vmem:[%s2173_s3 + $0x90] sm:$0xff]  ;;  %v1614_v46 = vld [vmem:[%s2173_s3 + $0x88] sm:$0xff] }
  0x2a   :  { %719 = vmatpush.bf16.msrb.mxu2 %v1619_v20  ;;  %v1623_v45 = vld [vmem:[%s2173_s3 + $0xd0] sm:$0xff]  ;;  %v1622_v47 = vld [vmem:[%s2173_s3 + $0xc8] sm:$0xff]  ;;  %v1604_v48 = vld [vmem:[%s2173_s3 + $0x38] sm:$0xff] }
  0x2b   :  { %733 = vmatpush.bf16.msrb.mxu3 %v1627_v30  ;;  %v1612_v49 = vld [vmem:[%s2173_s3 + $0x78] sm:$0xff]  ;;  %v1613_v50 = vld [vmem:[%s2173_s3 + $0x80] sm:$0xff]  ;;  %v1603_v55 = vld [vmem:[%s2173_s3 + $0x30] sm:$0xff] }
  0x2c   :  { %443 = vmatpush.bf16.msrb.mxu0 %v1253_v0  ;;  %v1621_v51 = vld [vmem:[%s2173_s3 + $0xc0] sm:$0xff]  ;;  %v1636_v52 = vld [vmem:[%s2173_s3 + $0x138] sm:$0xff]  ;;  %v1611_v56 = vld [vmem:[%s2173_s3 + $0x70] sm:$0xff] }
  0x2d   :  { %457 = vmatpush.bf16.msrb.mxu1 %v1257_v1  ;;  %v1644_v53 = vld [vmem:[%s2173_s3 + $0x178] sm:$0xff]  ;;  %v1635_v57 = vld [vmem:[%s2173_s3 + $0x130] sm:$0xff]  ;;  %v1602_v59 = vld [vmem:[%s2173_s3 + $0x28] sm:$0xff] }
  0x2e   :  { %720 = vmatpush.bf16.msrb.mxu2 %v1618_v38  ;;  %v1643_v58 = vld [vmem:[%s2173_s3 + $0x170] sm:$0xff]  ;;  %v1610_v60 = vld [vmem:[%s2173_s3 + $0x68] sm:$0xff]  ;;  %v1601_v63 = vld [vmem:[%s2173_s3 + $0x20] sm:$0xff] }
  0x2f   :  { %734 = vmatpush.bf16.msrb.mxu3 %v1626_v39  ;;  %v1634_v61 = vld [vmem:[%s2173_s3 + $0x128] sm:$0xff]  ;;  %v1609_v0 = vld [vmem:[%s2173_s3 + $0x60] sm:$0xff]  ;;  %v1600_v5 = vld [vmem:[%s2173_s3 + $0x18] sm:$0xff] }
  0x30   :  { %444 = vmatpush.bf16.msrb.mxu0 %v1245_v6  ;;  %v1642_v62 = vld [vmem:[%s2173_s3 + $0x168] sm:$0xff]  ;;  %v1633_v1 = vld [vmem:[%s2173_s3 + $0x120] sm:$0xff]  ;;  %v1608_v6 = vld [vmem:[%s2173_s3 + $0x58] sm:$0xff] }
  0x31   :  { %458 = vmatpush.bf16.msrb.mxu1 %v1249_v7  ;;  %v1641_v2 = vld [vmem:[%s2173_s3 + $0x160] sm:$0xff]  ;;  %v1632_v7 = vld [vmem:[%s2173_s3 + $0x118] sm:$0xff]  ;;  %v1599_v9 = vld [vmem:[%s2173_s3 + $0x10] sm:$0xff] }
  0x32   :  { %721 = vmatpush.bf16.msrb.mxu2 %v1617_v40  ;;  %v1640_v8 = vld [vmem:[%s2173_s3 + $0x158] sm:$0xff]  ;;  %v1607_v10 = vld [vmem:[%s2173_s3 + $0x50] sm:$0xff]  ;;  %v1598_v17 = vld [vmem:[%s2173_s3 + $0x8] sm:$0xff] }
  0x33   :  { %735 = vmatpush.bf16.msrb.mxu3 %v1625_v41  ;;  %v1631_v15 = vld [vmem:[%s2173_s3 + $0x110] sm:$0xff]  ;;  %v1638_v21 = vld [vmem:[%s2173_s3 + $0x148] sm:$0xff]  ;;  %v1597_v22 = vld [vmem:[%s2173_s3] sm:$0xff] }
  0x34   :  { %445 = vmatpush.bf16.msrb.mxu0 %v1237_v12  ;;  %v1639_v16 = vld [vmem:[%s2173_s3 + $0x150] sm:$0xff]  ;;  %v1605_v23 = vld [vmem:[%s2173_s3 + $0x40] sm:$0xff] }
  0x35   :  { %459 = vmatpush.bf16.msrb.mxu1 %v1241_v13  ;;  %v1629_v27 = vld [vmem:[%s2173_s3 + $0x100] sm:$0xff] }
  0x36   :  { %722 = vmatpush.bf16.msrb.mxu2 %v1616_v42  ;;  %v1637_v28 = vld [vmem:[%s2173_s3 + $0x140] sm:$0xff] }
  0x37   :  { %736 = vmatpush.bf16.msrb.mxu3 %v1624_v43 }
  0x38   :  { %446 = vmatpush.bf16.msrb.mxu0 %v1229_v18  ;;  %v1606_v18 = vld [vmem:[%s2173_s3 + $0x48] sm:$0xff] }
  0x39   :  { %460 = vmatpush.bf16.msrb.mxu1 %v1233_v19  ;;  %v1630_v19 = vld [vmem:[%s2173_s3 + $0x108] sm:$0xff] }
  0x3a   :  { %723 = vmatpush.bf16.msrb.mxu2 %v1615_v44 }
  0x3b   :  { %737 = vmatpush.bf16.msrb.mxu3 %v1623_v45 }
  0x3c   :  { %447 = vmatpush.bf16.msrb.mxu0 %v1221_v25 }
  0x3d   :  { %461 = vmatpush.bf16.msrb.mxu1 %v1225_v26  ;;  %v66_v26 = vld [vmem:[%s2174_s2] sm:$0x3] }
  0x3e   :  { %724 = vmatpush.bf16.msrb.mxu2 %v1614_v46  ;;  %v474_v35 = vperm.slane %v66_v26, 0  ;;  %v475_v20 = vperm.slane %v66_v26, 1 }
  0x3f   :  { %738 = vmatpush.bf16.msrb.mxu3 %v1622_v47 }
  0x40   :  { %448 = vmatpush.bf16.msrb.mxu0 %v1213_v32 }
  0x41   :  { %462 = vmatpush.bf16.msrb.mxu1 %v1217_v33 }
  0x42   :  { %725 = vmatpush.bf16.msrb.mxu2 %v1613_v50 }
  0x43   :  { %1276 = vmatmul.msk.bf16.vlgmr.msrb.gmra.mxu0 %vm2001_vm5, %v1275_v36  ;;  %739 = vmatpush.bf16.msrb.mxu3 %v1621_v51 }
  0x44   :  { %1279 = vmatmul.msk.bf16.vlgmr.msrb.gmra.mxu1 %vm2001_vm5, %v1275_v36  ;;  %842 = vmatpush.bf16.msra.mxu0 %v1604_v48 }
  0x45   :  { %856 = vmatpush.bf16.msra.mxu1 %v1612_v49 }
  0x46   :  { %999 = vmatpush.bf16.msra.mxu2 %v1636_v52 }
  0x47   :  { %1013 = vmatpush.bf16.msra.mxu3 %v1644_v53 }
  0x48   :  { %843 = vmatpush.bf16.msra.mxu0 %v1603_v55 }
  0x49   :  { %857 = vmatpush.bf16.msra.mxu1 %v1611_v56 }
  0x4a   :  { %1000 = vmatpush.bf16.msra.mxu2 %v1635_v57 }
  0x4b   :  { %1014 = vmatpush.bf16.msra.mxu3 %v1643_v58 }
  0x4c   :  { %844 = vmatpush.bf16.msra.mxu0 %v1602_v59 }
  0x4d   :  { %858 = vmatpush.bf16.msra.mxu1 %v1610_v60 }
  0x4e   :  { %1001 = vmatpush.bf16.msra.mxu2 %v1634_v61 }
  0x4f   :  { %1015 = vmatpush.bf16.msra.mxu3 %v1642_v62 }
  0x50   :  { %845 = vmatpush.bf16.msra.mxu0 %v1601_v63 }
  0x51   :  { %859 = vmatpush.bf16.msra.mxu1 %v1609_v0 }
  0x52   :  { %1002 = vmatpush.bf16.msra.mxu2 %v1633_v1 }
  0x53   :  { %1016 = vmatpush.bf16.msra.mxu3 %v1641_v2 }
  0x54   :  { %846 = vmatpush.bf16.msra.mxu0 %v1600_v5 }
  0x55   :  { %860 = vmatpush.bf16.msra.mxu1 %v1608_v6 }
  0x56   :  { %1003 = vmatpush.bf16.msra.mxu2 %v1632_v7 }
  0x57   :  { %1017 = vmatpush.bf16.msra.mxu3 %v1640_v8 }
  0x58   :  { %847 = vmatpush.bf16.msra.mxu0 %v1599_v9 }
  0x59   :  { %861 = vmatpush.bf16.msra.mxu1 %v1607_v10 }
  0x5a   :  { %1004 = vmatpush.bf16.msra.mxu2 %v1631_v15 }
  0x5b   :  { %1018 = vmatpush.bf16.msra.mxu3 %v1639_v16 }
  0x5c   :  { %848 = vmatpush.bf16.msra.mxu0 %v1598_v17 }
  0x5d   :  { %862 = vmatpush.bf16.msra.mxu1 %v1606_v18 }
  0x5e   :  { %1005 = vmatpush.bf16.msra.mxu2 %v1630_v19 }
  0x5f   :  { %1019 = vmatpush.bf16.msra.mxu3 %v1638_v21 }
  0x60   :  { %849 = vmatpush.bf16.msra.mxu0 %v1597_v22 }
  0x61   :  { %863 = vmatpush.bf16.msra.mxu1 %v1605_v23 }
  0x62   :  { %1006 = vmatpush.bf16.msra.mxu2 %v1629_v27 }
  0x63   :  { %1020 = vmatpush.bf16.msra.mxu3 %v1637_v28 }
  0xa0   :  { %v217_v3 = vpop.f32.mrf.mxu0 }
  0xa1   :  { %v231_v4 = vpop.f32.mrf.mxu1 }
  0xa8   :  { %v219_v11 = vpop.f32.mrf.mxu0  ;;  %v325_v13 = vpop.f32.mrf.mxu2 }
  0xa9   :  { %v233_v12 = vpop.f32.mrf.mxu1  ;;  %v339_v14 = vpop.f32.mrf.mxu3  ;;  %v326_v29 = vadd.f32 %v325_v13, %v217_v3 }
  0xaa   :  { %v340_v31 = vadd.f32 %v339_v14, %v231_v4 }
  0xb0   :  { %v327_v32 = vpop.f32.mrf.mxu2 }
  0xb1   :  { %v341_v33 = vpop.f32.mrf.mxu3  ;;  %v328_v30 = vadd.f32 %v327_v32, %v219_v11 }
  0xb2   :  { %v342_v38 = vadd.f32 %v341_v33, %v233_v12  ;;  %v1646_v33 = vld [vmem:[%s2175_s4] ss:$0 sm:$0xff] }
  0xc0   :  { %v450_v24 = vpop.f32.mrf.mxu0 }
  0xc1   :  { %v464_v25 = vpop.f32.mrf.mxu1  ;;  %v469_v34 = vadd.f32 %v450_v24, %v326_v29 }
  0xc2   :  { %v470_v36 = vadd.f32 %v464_v25, %v340_v31 }
  0xc3   :  { %v478_v41 = vadd.f32 %v474_v35, %v469_v34 }
  0xc4   :  { %v479_v42 = vadd.f32 %v475_v20, %v470_v36 }
  0xc5   :  { %v482_v47 = vmax.f32 %v478_v41, 0.0 }
  0xc6   :  { %v483_v48 = vmax.f32 %v479_v42, 0.0 }
  0xc8   :  { %v452_v39 = vpop.f32.mrf.mxu0 }
  0xc9   :  { %v466_v40 = vpop.f32.mrf.mxu1  ;;  %v471_v43 = vadd.f32 %v452_v39, %v328_v30 }
  0xca   :  { %v472_v44 = vadd.f32 %v466_v40, %v342_v38 }
  0xcb   :  { %v480_v45 = vadd.f32 %v474_v35, %v471_v43 }
  0xcc   :  { %v481_v46 = vadd.f32 %v475_v20, %v472_v44 }
  0xcd   :  { %v484_v49 = vmax.f32 %v480_v45, 0.0 }
  0xce   :  { %v485_v50 = vmax.f32 %v481_v46, 0.0 }
  0xcf   :  { %v486_v51 = vpack.c.bf16 %v484_v49, %v482_v47 }
  0xd0   :  { %v487_v52 = vpack.c.bf16 %v485_v50, %v483_v48 }
  0xd1   :  { %v489_v53 = vunpack.c.l.bf16 %v486_v51  ;;  %v491_v55 = vunpack.c.h.bf16 %v486_v51  ;;  %726 = vmatmul.bf16.vlgmr.msrb.gmra.mxu2 %v486_v51 }
  0xd2   :  { %v490_v56 = vunpack.c.l.bf16 %v487_v52  ;;  %v492_v57 = vunpack.c.h.bf16 %v487_v52  ;;  %740 = vmatmul.bf16.vlgmr.msrb.gmra.mxu3 %v487_v52 }
  0xd3   :  { %v498_v58 = vrot.slane %v489_v53, 7  ;;  %v500_v59 = vrot.slane %v491_v55, 7 }
  0xd4   :  { %v499_v60 = vrot.slane %v490_v56, 7  ;;  %v502_v61 = vrot.slane %v492_v57, 7 }
  0xd5   :  { %v501_v62 = vsel %vm497_vm6, %v498_v58, %v500_v59  ;;  %510 = vst [vmem:[#allocation3 + $0x28] sm:$0xfe] %v498_v58 }
  0xd6   :  { %v503_v63 = vsel %vm497_vm6, %v499_v60, %v502_v61  ;;  %514 = vst [vmem:[#allocation3 + $0x18] sm:$0x1] %v500_v59  ;;  %v538_v2 = vrot.slane %v501_v62, 2 }
  0xd7   :  { %511 = vst [vmem:[#allocation3 + $0x10] sm:$0xfe] %v499_v60  ;;  %v541_v10 = vrot.slane %v503_v63, 2 }
  0xd8   :  { %515 = vst [vmem:[#allocation3 + $0x20] sm:$0x1] %v502_v61 }
  0xdc   :  { %v516_v0 = vld [vmem:[#allocation3 + $0x28] sm:$0xff] }
  0xdd   :  { %v526_v1 = vld [vmem:[#allocation3 + $0x28] sm:$0xfc]  ;;  %v1441_v3 = vpack.c.bf16 %v501_v62, %v516_v0  ;;  %v528_v5 = vld [vmem:[#allocation3 + $0x18] sm:$0x3] }
  0xde   :  { %v537_v4 = vrot.slane %v526_v1, 2  ;;  %v517_v6 = vld [vmem:[#allocation3 + $0x10] sm:$0xff]  ;;  %v543_v8 = vrot.slane %v528_v5, 2 }
  0xdf   :  { %1442 = vmatmul.msk.bf16.vlgmr.msra.gmra.mxu0 %vm1911_vm2, %v1441_v3  ;;  %v527_v9 = vld [vmem:[#allocation3 + $0x10] sm:$0xfc]  ;;  %v1444_v11 = vpack.c.bf16 %v503_v63, %v517_v6  ;;  %v529_v14 = vld [vmem:[#allocation3 + $0x20] sm:$0x3] }
  0xe0   :  { %v539_v7 = vsel %vm536_vm7, %v537_v4, %v538_v2  ;;  %v540_v12 = vrot.slane %v527_v9, 2  ;;  %v544_v13 = vsel %vm536_vm7, %v538_v2, %v543_v8  ;;  %v545_v17 = vrot.slane %v529_v14, 2 }
  0xe1   :  { %1445 = vmatmul.msk.bf16.vlgmr.msra.gmra.mxu1 %vm1911_vm2, %v1444_v11  ;;  %v1543_v15 = vpack.c.bf16 %v544_v13, %v539_v7 }
  0xe2   :  { %v542_v16 = vsel %vm536_vm7, %v540_v12, %v541_v10  ;;  %v546_v18 = vsel %vm536_vm7, %v541_v10, %v545_v17 }
  0xe3   :  { %1544 = vmatmul.msk.bf16.vlgmr.msra.gmra.mxu2 %vm2001_vm5, %v1543_v15  ;;  %v1546_v19 = vpack.c.bf16 %v546_v18, %v542_v16 }
  0xe5   :  { %1547 = vmatmul.msk.bf16.vlgmr.msra.gmra.mxu3 %vm2001_vm5, %v1546_v19 }
 0x154   :  { %v727_v21 = vpop.f32.mrf.mxu2 }
 0x155   :  { %v741_v22 = vpop.f32.mrf.mxu3 }
 0x156   :  { %v742_v54 = vadd.f32 %v741_v22, %v727_v21 }
 0x15c   :  { %v729_v23 = vpop.f32.mrf.mxu2  ;;  %v851_v25 = vpop.f32.mrf.mxu0 }
 0x15d   :  { %v743_v24 = vpop.f32.mrf.mxu3  ;;  %v852_v26 = vadd.f32 %v851_v25, %v742_v54 }
 0x15e   :  { %v865_v28 = vpop.f32.mrf.mxu1  ;;  %v744_v35 = vadd.f32 %v743_v24, %v729_v23 }
 0x15f   :  { %v866_v31 = vadd.f32 %v865_v28, %v852_v26 }
 0x164   :  { %v853_v34 = vpop.f32.mrf.mxu0 }
 0x165   :  { %v854_v36 = vadd.f32 %v853_v34, %v744_v35 }
 0x166   :  { %v1008_v27 = vpop.f32.mrf.mxu2  ;;  %v867_v38 = vpop.f32.mrf.mxu1 }
 0x167   :  { %v868_v40 = vadd.f32 %v867_v38, %v854_v36 }
 0x168   :  { %v1022_v29 = vpop.f32.mrf.mxu3 }
 0x169   :  { %v1023_v32 = vadd.f32 %v1022_v29, %v1008_v27 }
 0x16b   :  { %v1027_v37 = vadd.f32 %v1023_v32, %v866_v31 }
 0x16d   :  { %v1032_v20 = vadd.f32 %v1646_v33, %v1027_v37 }
 0x16e   :  { %v1010_v30 = vpop.f32.mrf.mxu2 }
 0x16f   :  { %1034 = vst [vmem:[%s2176_s5] sm:$0xff] %v1032_v20 }
 0x170   :  { %v1024_v39 = vpop.f32.mrf.mxu3 }
 0x171   :  { %v1025_v41 = vadd.f32 %v1024_v39, %v1010_v30 }
 0x173   :  { %v1028_v42 = vadd.f32 %v1025_v41, %v868_v40 }
 0x175   :  { %v1033_v43 = vadd.f32 %v1646_v33, %v1028_v42 }
 0x177   :  { %1035 = vst [vmem:[%s2176_s5 + $0x8] sm:$0xff] %v1033_v43 }

</bundles_post_ra>
